<compile_context>
chip_gen: v5e
topology: v5e:2x2
jax: 0.10.0
libtpu: 0.0.40
codegen_flags: <defaults>
</compile_context>

<pallas_src>
import functools

import jax
import jax.numpy as jnp
from jax.experimental import pallas as pl
from jax.experimental.pallas import tpu as pltpu

_HIGHEST = jax.lax.Precision.HIGHEST


def gat_kernel(x_ref, gate_ref, w_ref, o_ref, *, out_features, concat):
    """One (batch, time-tile) block of the GAT forward.

    x_ref:    (C, M)      native NCHW layout, M = T_TILE*N (lane-dense loads).
    gate_ref: (M, M)      precomputed mask: 1.0 -> keep logit,
                          -9e15 -> adjacency-masked (same timestep),
                          -1e30 -> cross-timestep (softmax weight exactly 0).
    w_ref:    (C, F+2)    [W | W@a1 | W@a2] -- attention vector folded into W.
    o_ref:    (M, F)      output slab (rows ordered (t_local, node)).
    """
    F = out_features
    x = x_ref[...]                                   # (C, M)
    w = w_ref[...]                                   # (C, F+2)

    # One MXU matmul for the whole time tile, contracting on C (dim 0 of both
    # operands) so the native (C, M) layout needs no transpose:
    #   wh[m, col] = sum_c x[c, m] * w_aug[c, col]    -> (M, F+2)
    wh = jax.lax.dot_general(
        x, w, dimension_numbers=(((0,), (0,)), ((), ())),
        preferred_element_type=jnp.float32, precision=_HIGHEST)

    f1 = wh[:, F:F + 1]                              # (M, 1) = Wh @ a1 (column)
    # f2 as a ROW vector without any transpose/relayout: (W@a2)^T @ x -> (1, M).
    f2 = jax.lax.dot_general(
        w[:, F + 1:F + 2], x, dimension_numbers=(((0,), (0,)), ((), ())),
        preferred_element_type=jnp.float32, precision=_HIGHEST)

    e = f1 + f2                                      # (M, M): e[r,s] = f1[r]+f2[s]
    e = jnp.where(e > 0, e, 0.2 * e)                 # LeakyReLU(0.2)

    gate = gate_ref[...]                             # (M, M)
    att = jnp.where(gate > 0, e, gate)               # adjacency + block-diag mask

    # Softmax over neighbours (within the same timestep; cross-timestep entries
    # are -1e30 -> exp underflows to exactly 0, contributing nothing below).
    m = jnp.max(att, axis=-1, keepdims=True)
    p = jnp.exp(att - m)
    att = p * (1.0 / jnp.sum(p, axis=-1, keepdims=True))
    # TODO(synk): F.dropout(attention, p=0.25) -- identity in eval mode.

    # One MXU matmul aggregates all T_TILE timesteps at once (block-diagonal att).
    h = jnp.dot(att, wh[:, :F], preferred_element_type=jnp.float32,
                precision=_HIGHEST)                  # (M, F)
    if concat:
        # ELU(alpha=1); clamp the exp argument so h >> 0 never produces inf.
        h = jnp.where(h > 0, h, jnp.exp(jnp.minimum(h, 0.0)) - 1.0)
    o_ref[...] = h.astype(o_ref.dtype)


def _pick_t_tile(T, N, max_rows=256):
    """Smallest divisor Tt of T with (Tt*N) % 128 == 0 and Tt*N <= max_rows.

    (Tt*N) % 128 == 0 keeps the x block's last dim (and the gate / logit matrix)
    a multiple of 128 lanes; picking the SMALLEST such Tt bounds the O(M^2)
    block-diagonal redundancy and the VMEM footprint.  Falls back to a larger
    row cap, then to Tt = T (block == full axis, always legal).
    """
    for cap in (max_rows, 1024):
        for tt in range(1, T + 1):
            if T % tt == 0 and (tt * N) % 128 == 0 and tt * N <= cap:
                return tt
    return T


def graph_attention_layer(x, adj, W, a, *, concat=True, max_rows_per_block=256):
    """x: (B, C, T, N) f32; adj: (K, N, N); W: (C, F); a: (2F, 1) -> (B, T, N, F)."""
    B, C, T, N = x.shape
    F = W.shape[1]

    t_tile = _pick_t_tile(T, N, max_rows_per_block)
    M = t_tile * N
    grid = (B, T // t_tile)

    # ---- wrapper-side glue (tiny / free): ------------------------------------
    # attention-vector fold: W_aug = [W | W@a1 | W@a2]
    a1 = a[:F, :]
    a2 = a[F:, :]
    w_aug = jnp.concatenate(
        [W, jnp.dot(W, a1, precision=_HIGHEST),
         jnp.dot(W, a2, precision=_HIGHEST)], axis=1)             # (C, F+2)
    # block-diagonal gate: 1.0 keep / -9e15 adjacency-masked / -1e30 cross-step
    adj_mean = jnp.mean(adj, axis=0)                              # (N, N)
    eye_t = jnp.eye(t_tile, dtype=jnp.float32)
    in_block = jnp.kron(eye_t, jnp.ones((N, N), jnp.float32))     # (M, M)
    keep = jnp.kron(eye_t, (adj_mean > 0).astype(jnp.float32))    # (M, M)
    gate = jnp.where(keep > 0, 1.0,
                     jnp.where(in_block > 0, -9.0e15, -1.0e30)).astype(jnp.float32)
    # metadata-only reshape of x -- NO transpose / extra HBM pass
    x_flat = x.reshape(B, C, T * N)

    kernel = functools.partial(gat_kernel, out_features=F, concat=concat)

    out = pl.pallas_call(
        kernel,
        out_shape=jax.ShapeDtypeStruct((B, T * N, F), x.dtype),
        grid_spec=pltpu.PrefetchScalarGridSpec(
            num_scalar_prefetch=0,
            grid=grid,
            in_specs=[
                # x: one lane-dense (C, M) slab per grid step.
                pl.BlockSpec((None, C, M), lambda b, tb: (b, 0, tb)),
                # gate / W_aug: constant block index -> fetched once, stays in VMEM.
                pl.BlockSpec((M, M), lambda b, tb: (0, 0)),
                pl.BlockSpec((C, F + 2), lambda b, tb: (0, 0)),
            ],
            out_specs=pl.BlockSpec((None, M, F), lambda b, tb: (b, tb, 0)),
        ),
        compiler_params=pltpu.CompilerParams(
            # Both axes independent -> megacore-shardable.
            dimension_semantics=("parallel", "parallel"),
            # Blocks + (M,M) intermediates are well under a MiB at these sizes;
            # the explicit limit leaves headroom for larger M while staying
            # inside v7x's 64 MiB VMEM.
            vmem_limit_bytes=32 * 1024 * 1024,
        ),
    )(x_flat, gate, w_aug)
    return out.reshape(B, T, N, F)


def _reference(x, adj, W, a, concat=True):
    """Pure-JAX reference mirroring the PyTorch forward (eval mode)."""
    B, C, T, N = x.shape
    F = W.shape[1]
    adj_mean = jnp.mean(adj, axis=0)                 # (N, N)
    xt = jnp.transpose(x, (0, 2, 3, 1))              # (B, T, N, C)
    Wh = jnp.einsum("btnc,cf->btnf", xt, W, precision=_HIGHEST)
    a1, a2 = a[:F, 0], a[F:, 0]
    f1 = jnp.einsum("btnf,f->btn", Wh, a1, precision=_HIGHEST)
    f2 = jnp.einsum("btnf,f->btn", Wh, a2, precision=_HIGHEST)
    e = f1[..., :, None] + f2[..., None, :]          # (B, T, N, N)
    e = jnp.where(e > 0, e, 0.2 * e)
    att = jnp.where(adj_mean[None, None] > 0, e, -9.0e15)
    att = jax.nn.softmax(att, axis=-1)
    h = jnp.einsum("btij,btjf->btif", att, Wh, precision=_HIGHEST)
    return jnp.where(h > 0, h, jnp.exp(h) - 1.0) if concat else h


def _xavier_uniform(key, shape, gain):
    fan_in, fan_out = shape
    bound = gain * (6.0 / (fan_in + fan_out)) ** 0.5
    return jax.random.uniform(key, shape, jnp.float32, -bound, bound)


if __name__ == "__main__":
    key = jax.random.PRNGKey(0)
    k1, k2, k3, k4 = jax.random.split(key, 4)

    B, C, T, N = 2, 4, 64, 8         # batch, in_features, steps, nodes
    Fout = 16                        # out_features

    x = jax.random.normal(k1, (B, C, T, N), jnp.float32)
    adj = (jax.random.uniform(k2, (3, N, N), jnp.float32) > 0.5).astype(jnp.float32)
    W = _xavier_uniform(k3, (C, Fout), 1.414)
    a = _xavier_uniform(k4, (2 * Fout, 1), 1.414)

    out = graph_attention_layer(x, adj, W, a, concat=True)
    out = jax.block_until_ready(out)

    ref = _reference(x, adj, W, a, concat=True)
    assert out.shape == (B, T, N, Fout)
    err = float(jnp.max(jnp.abs(out - ref)))
    assert jnp.allclose(out, ref, atol=1e-4, rtol=1e-4), err

    print("KERNEL_OK")
</pallas_src>

<mosaic_0001>
module attributes {stable_mosaic.version = 11 : i64} {
  func.func @gat_kernel(%arg0: i32, %arg1: i32, %arg2: memref<1x4x128xf32, #tpu.memory_space<vmem>>, %arg3: memref<128x128xf32, #tpu.memory_space<vmem>>, %arg4: memref<4x18xf32, #tpu.memory_space<vmem>>, %arg5: memref<1x128x16xf32, #tpu.memory_space<vmem>>) attributes {dimension_semantics = [#tpu.dimension_semantics<parallel>, #tpu.dimension_semantics<parallel>], iteration_bounds = array<i64: 2, 4>, scalar_prefetch = 0 : i64, scratch_operands = 0 : i64, tpu.core_type = #tpu.core_type<tc>, window_params = [{transform_indices = @transform_0, window_bounds = array<i64: 1, 4, 128>}, {pipeline_mode = #tpu.pipeline_mode<synchronous>, transform_indices = @transform_1, window_bounds = array<i64: 128, 128>}, {pipeline_mode = #tpu.pipeline_mode<synchronous>, transform_indices = @transform_2, window_bounds = array<i64: 4, 18>}, {transform_indices = @transform_3, window_bounds = array<i64: 1, 128, 16>}]} {
    %c0 = arith.constant 0 : index
    %c0_0 = arith.constant 0 : index
    %c0_1 = arith.constant 0 : index
    %0 = vector.load %arg2[%c0, %c0_0, %c0_1] : memref<1x4x128xf32, #tpu.memory_space<vmem>>, vector<1x4x128xf32>
    %1 = vector.shape_cast %0 : vector<1x4x128xf32> to vector<4x128xf32>
    %c0_2 = arith.constant 0 : index
    %c0_3 = arith.constant 0 : index
    %2 = vector.load %arg4[%c0_2, %c0_3] : memref<4x18xf32, #tpu.memory_space<vmem>>, vector<4x18xf32>
    %cst = arith.constant dense<0.000000e+00> : vector<128x18xf32>
    %3 = tpu.matmul %1, %2, %cst {dimension_numbers = #tpu.dot_dimension_numbers<[0], [0], [1], [1], [0, 1, 1, 1], [], []>, precision = #tpu.contract_precision<fp32>} : vector<4x128xf32>, vector<4x18xf32>, vector<128x18xf32> -> vector<128x18xf32>
    %4 = vector.extract_strided_slice %3 {offsets = [0, 16], sizes = [128, 1], strides = [1, 1]} : vector<128x18xf32> to vector<128x1xf32>
    %5 = vector.extract_strided_slice %2 {offsets = [0, 17], sizes = [4, 1], strides = [1, 1]} : vector<4x18xf32> to vector<4x1xf32>
    %cst_4 = arith.constant dense<0.000000e+00> : vector<1x128xf32>
    %6 = tpu.matmul %5, %1, %cst_4 {dimension_numbers = #tpu.dot_dimension_numbers<[0], [0], [1], [1], [0, 1, 1, 1], [], []>, precision = #tpu.contract_precision<fp32>} : vector<4x1xf32>, vector<4x128xf32>, vector<1x128xf32> -> vector<1x128xf32>
    %7 = vector.broadcast %4 : vector<128x1xf32> to vector<128x128xf32>
    %8 = vector.broadcast %6 : vector<1x128xf32> to vector<128x128xf32>
    %9 = arith.addf %7, %8 : vector<128x128xf32>
    %cst_5 = arith.constant 0.000000e+00 : f32
    %10 = vector.broadcast %cst_5 : f32 to vector<128x128xf32>
    %11 = arith.cmpf ogt, %9, %10 : vector<128x128xf32>
    %cst_6 = arith.constant 2.000000e-01 : f32
    %12 = vector.broadcast %cst_6 : f32 to vector<128x128xf32>
    %13 = arith.mulf %12, %9 : vector<128x128xf32>
    %14 = arith.select %11, %9, %13 : vector<128x128xi1>, vector<128x128xf32>
    %c0_7 = arith.constant 0 : index
    %c0_8 = arith.constant 0 : index
    %15 = vector.load %arg3[%c0_7, %c0_8] : memref<128x128xf32, #tpu.memory_space<vmem>>, vector<128x128xf32>
    %cst_9 = arith.constant 0.000000e+00 : f32
    %16 = vector.broadcast %cst_9 : f32 to vector<128x128xf32>
    %17 = arith.cmpf ogt, %15, %16 : vector<128x128xf32>
    %18 = arith.select %17, %14, %15 : vector<128x128xi1>, vector<128x128xf32>
    %cst_10 = arith.constant dense<0xFF800000> : vector<128xf32>
    %19 = vector.multi_reduction <maximumf>, %18, %cst_10 [1] : vector<128x128xf32> to vector<128xf32>
    %20 = vector.shape_cast %19 : vector<128xf32> to vector<128x1xf32>
    %21 = vector.broadcast %20 : vector<128x1xf32> to vector<128x128xf32>
    %22 = arith.subf %18, %21 : vector<128x128xf32>
    %23 = math.exp %22 : vector<128x128xf32>
    %cst_11 = arith.constant dense<0.000000e+00> : vector<128xf32>
    %24 = vector.multi_reduction <add>, %23, %cst_11 [1] : vector<128x128xf32> to vector<128xf32>
    %25 = vector.shape_cast %24 : vector<128xf32> to vector<128x1xf32>
    %cst_12 = arith.constant 1.000000e+00 : f32
    %26 = vector.broadcast %cst_12 : f32 to vector<128x1xf32>
    %27 = arith.divf %26, %25 : vector<128x1xf32>
    %28 = vector.broadcast %27 : vector<128x1xf32> to vector<128x128xf32>
    %29 = arith.mulf %23, %28 : vector<128x128xf32>
    %30 = vector.extract_strided_slice %3 {offsets = [0, 0], sizes = [128, 16], strides = [1, 1]} : vector<128x18xf32> to vector<128x16xf32>
    %cst_13 = arith.constant dense<0.000000e+00> : vector<128x16xf32>
    %31 = tpu.matmul %29, %30, %cst_13 {dimension_numbers = #tpu.dot_dimension_numbers<[1], [0], [0], [1], [0, 0, 1, 1], [], []>, precision = #tpu.contract_precision<fp32>} : vector<128x128xf32>, vector<128x16xf32>, vector<128x16xf32> -> vector<128x16xf32>
    %cst_14 = arith.constant 0.000000e+00 : f32
    %32 = vector.broadcast %cst_14 : f32 to vector<128x16xf32>
    %33 = arith.cmpf ogt, %31, %32 : vector<128x16xf32>
    %cst_15 = arith.constant 0.000000e+00 : f32
    %34 = vector.broadcast %cst_15 : f32 to vector<128x16xf32>
    %35 = arith.minimumf %31, %34 : vector<128x16xf32>
    %36 = math.exp %35 : vector<128x16xf32>
    %cst_16 = arith.constant 1.000000e+00 : f32
    %37 = vector.broadcast %cst_16 : f32 to vector<128x16xf32>
    %38 = arith.subf %36, %37 : vector<128x16xf32>
    %39 = arith.select %33, %31, %38 : vector<128x16xi1>, vector<128x16xf32>
    %c0_17 = arith.constant 0 : index
    %c0_18 = arith.constant 0 : index
    %c0_19 = arith.constant 0 : index
    %40 = vector.load %arg5[%c0_17, %c0_18, %c0_19] : memref<1x128x16xf32, #tpu.memory_space<vmem>>, vector<1x128x16xf32>
    %41 = vector.shape_cast %40 : vector<1x128x16xf32> to vector<128x16xf32>
    %42 = vector.shape_cast %39 : vector<128x16xf32> to vector<1x128x16xf32>
    tpu.vector_store %arg5[%c0_17, %c0_18, %c0_19], %42 {strides = array<i32>} : memref<1x128x16xf32, #tpu.memory_space<vmem>>, vector<1x128x16xf32>,
    return
  }
  func.func @transform_0(%arg0: i32, %arg1: i32) -> (i32, i32, i32) {
    %c0_i32 = arith.constant 0 : i32
    %c0_i32_0 = arith.constant 0 : i32
    return %arg0, %c0_i32, %arg1 : i32, i32, i32
  }
  func.func @transform_1(%arg0: i32, %arg1: i32) -> (i32, i32) {
    %c0_i32 = arith.constant 0 : i32
    %c0_i32_0 = arith.constant 0 : i32
    %c0_i32_1 = arith.constant 0 : i32
    return %c0_i32, %c0_i32_0 : i32, i32
  }
  func.func @transform_2(%arg0: i32, %arg1: i32) -> (i32, i32) {
    %c0_i32 = arith.constant 0 : i32
    %c0_i32_0 = arith.constant 0 : i32
    %c0_i32_1 = arith.constant 0 : i32
    return %c0_i32, %c0_i32_0 : i32, i32
  }
  func.func @transform_3(%arg0: i32, %arg1: i32) -> (i32, i32, i32) {
    %c0_i32 = arith.constant 0 : i32
    %c0_i32_0 = arith.constant 0 : i32
    return %arg0, %arg1, %c0_i32 : i32, i32, i32
  }
}

</mosaic_0001>

<bundles_post_ra>
// kernel: tpu_custom_call.1
= control target key start
LH: loop header
LB: loop body
LE: loop exit
PB: predicated region body
PF: predicated region fallthrough
CT: control target
= control target key end

     0   :  { %s4246_s0 = inlined_call_operand.hbm [shape: f32[2,4,512], index: 0, kind: input, shape index: {}]   ;;  %s4247_s1 = inlined_call_operand.hbm [shape: f32[128,128], index: 1, kind: input, shape index: {}]   ;;  %s4248_s2 = inlined_call_operand.hbm [shape: f32[4,18], index: 2, kind: input, shape index: {}]   ;;  %s4249_s3 = inlined_call_operand.vmem [shape: f32[2,512,16], index: 3, kind: output, shape index: {}]  }
   0x1   :  { %4251 = sst [smem:[#allocation10_spill]] %s4247_s1 }
   0x2   :  { %4252 = sst [smem:[#allocation11_spill]] %s4248_s2 }
   0x3   :  { %8 = vsyncpa [#allocation3], 0 }
   0x4   :  { %10 = vsyncpa [#allocation3 + $0x1], 0 }
   0x5   :  { %11 = vsyncpa [#allocation5], 0  ;;  %s3149_s12 = smov 0   ;;  %s3151_s13 = smov 0  }
   0x6   :  { %s3153_s14 = smov 0   ;;  %s3155_s15 = smov 0  }
   0x7   :  { %s3157_s16 = smov 0   ;;  %s3159_s17 = smov 0  }
   0x8   :  { %s3161_s18 = smov 0   ;;  %s3163_s19 = smov 0  }
   0x9 LB: > { %s2729_s20 = sadd.s32 4294967295, %s3121_s19   ;;  %p2731_p0 = scmp.ge.s32.totalorder %s3121_s19, 1  ;;  %s3121_s19 = sphi %s3163_s19, %s17_s19   ;;  %s3117_s18 = sphi %s3161_s18, %s4273_s18   ;;  %s3113_s17 = sphi %s3159_s17, %s4272_s17   ;;  %s3109_s16 = sphi %s3157_s16, %s4271_s16   ;;  %s3105_s15 = sphi %s3155_s15, %s4270_s15   ;;  %s3101_s14 = sphi %s3153_s14, %s4269_s14   ;;  %s3097_s13 = sphi %s3151_s13, %s4268_s13   ;;  %s3093_s12 = sphi %s3149_s12, %s4267_s12  }
   0xa   : > { %p3191_p1 = scmp.eq.s32.totalorder %s2729_s20, 0  ;;  %p132_p2 = scmp.lt.s32.totalorder %s3121_s19, 9 }
   0xb   : > { %s4254_s1 = sld [smem:[#allocation10_spill]]  ;;  %s3123_s26 = smov [#allocation4]  }
   0xc   : > { %p3199_p3 = pnand %p2731_p0, %p132_p2  ;;  %s145_s27 = sshll.u32 %s3123_s26, 4  ;;  %s146_s27 = int_to_ptr.vmem [resolvable:$true] %s145_s27 }
   0xd   : > { %s4256_s2 = sld [smem:[#allocation11_spill]]  ;;  %s3124_s4 = smov 128  }
   0xe   : > { %p2775_p4 = pneg %p3199_p3  ;;  %s3125_s5 = smov 8  }
   0xf   : > { %s3126_s6 = smov [#allocation6]   ;;  %s26_s8 = sadd.s32 1, %s3113_s17 }
  0x10   : > { %p2776_p5 = pnand %p2775_p4, %p3191_p1  ;;  %s160_s7 = sshll.u32 %s3126_s6, 4  ;;  %s161_s7 = int_to_ptr.vmem [resolvable:$true] %s160_s7 }
  0x11   : > { %s143_s24 = sshll.u32 %s4254_s1, 4  ;;  %s29_s9 = sadd.s32 1, %s3117_s18  ;;  %s144_s24 = int_to_ptr.hbm [resolvable:$true] %s143_s24 }
  0x12   : > { %2778 = dma.hbm_to_vmem [thread:$0]  (!%p2776_p5), %s144_s24, 2048, %s146_s27, [#allocation5], %s3124_s4, %s3124_s4, %s3125_s5  }
  0x13   : > { %s158_s30 = sshll.u32 %s4256_s2, 4  ;;  %p27_p6 = scmp.ge.s32.totalorder %s26_s8, 4  ;;  %s159_s30 = int_to_ptr.hbm [resolvable:$true] %s158_s30 }
  0x14   : > { %2781 = dma.hbm_to_vmem [thread:$0]  (!%p2776_p5), %s159_s30, 64, %s161_s7, [#allocation5]  }
  0x15   : > { %s38_s10 = sadd.s32 1, %s3101_s14  ;;  %p45_p7 = scmp.ne.s32.totalorder %s3101_s14, %s3097_s13 }
  0x16   : > { %p46_p8 = scmp.eq.s32.totalorder %s3121_s19, 0  ;;  %s4275_s8 = smov (%p27_p6, %s26_s8), 0 }
  0x17   : > { %s4277_s9 = smov (!%p27_p6, %s29_s9), %s3117_s18  ;;  %s34_s11 = ssub.s32 %s3113_s17, %s4275_s8 }
  0x18   : > { %p3221_p9 = por %p46_p8, %p45_p7  ;;  %p31_p10 = scmp.ge.s32.totalorder %s4277_s9, 2 }
  0x19   : > { %p51_p11 = scmp.ne.s32.totalorder %s3097_s13, %s3093_s12  ;;  %p2788_p12 = scmp.lt.s32.totalorder %s3121_s19, 8 }
  0x1a   : > { %s171_s22 = sand.u32 1, %s3101_s14   ;;  %s4279_s9 = smov (%p31_p10, %s4277_s9), 0 }
  0x1b   : > { %4258 = sst [smem:[#allocation9_spill]] %s4279_s9  ;;  %p3233_p13 = por %p3191_p1, %p51_p11 }
  0x1c   : > { %s33_s24 = ssub.s32 %s3117_s18, %s4279_s9  ;;  %s2735_s26 = sshll.u32 %s171_s22, 2 }
  0x1d   : > { %s35_s27 = sor.u32 %s34_s11, %s33_s24  ;;  %s2736_s28 = sshll.u32 %s3117_s18, 2 }
  0x1e   : > { %p36_p0 = scmp.eq.s32.totalorder %s35_s27, 0  ;;  %s179_s29 = sadd.s32 %s3113_s17, %s2736_s28 }
  0x1f   : > { %s175_s30 = scalar_lea.vmem [#allocation2], %s2735_s26  ;;  %s2737_s5 = sshll.u32 %s179_s29, 2 }
  0x20   : > { %s185_s12 = sshll.u32 %s175_s30, 4  ;;  %s181_s1 = scalar_lea.hbm %s4246_s0, %s2737_s5  ;;  %s186_s12 = int_to_ptr.vmem [resolvable:$true] %s185_s12 }
  0x21   : > { %s3242_s4 = scalar_select %p36_p0, %s3101_s14, %s38_s10  }
  0x22   : > { %p2783_p2 = pnand %p2788_p12, %p3221_p9  ;;  %s183_s2 = sshll.u32 %s181_s1, 4  ;;  %s184_s2 = int_to_ptr.hbm [resolvable:$true] %s183_s2 }
  0x23   : > { %s172_s9 = scalar_lea.sflag [#allocation3], %s171_s22  ;;  %194 = sbr.rel (%p3199_p3) target bundleno = 1563 (0x61b), region = 32 }
  0x24   : > { %2785 = dma.hbm_to_vmem [thread:$0]  (!%p2783_p2), %s184_s2, 64, %s186_s12, %s172_s9  }
  0x25   : > { %s196_s10 = sand.u32 (!%p3199_p3), 1, %s3097_s13  }
  0x26   : > { %s2739_s11 = sshll.u32 (!%p3199_p3), %s196_s10, 2  ;;  %s197_s24 = scalar_lea.sflag (!%p3199_p3), [#allocation3], %s196_s10 }
  0x27   : > { %s200_s26 = scalar_lea.vmem (!%p3199_p3), [#allocation2], %s2739_s11 }
  0x28   : > { %3084 = dma.done.wait (%p3233_p13), %s197_s24, 64  }
  0x29   : > { %3086 = vsyncadd (%p3233_p13), %s197_s24, 4294967232 }
  0x2a   : > { %3088 = dma.done.wait (%p3191_p1), [#allocation5], 2112  }
  0x2b   : > { %3090 = vsyncadd (%p3191_p1), [#allocation5], 4294965184  ;;  %vm331_vm0 = vcmask 1043456   ;;  %v248_v0 = vld [vmem:[%s200_s26] sm:$0xf]  ;;  %vm282_vm1 = vcmask 31744  }
  0x2c   : > { %v3262_v1 = vld [vmem:[#allocation6] sm:$0xf]  ;;  %250 = vxpose.xlu0.b32.start.end [1/1] (short) %v248_v0, 128  ;;  %v985_v4 = vsel %vm331_vm0, %v248_v0, 0  ;;  %s3127_s1 = smov 111   ;;  %s2742_s2 = sshll.u32 %s3105_s15, 4 }
  0x2d   : > { %v333_v2 = vsel %vm331_vm0, %v3262_v1, 0  ;;  %v3265_v6 = vand.u32 4294901760, %v985_v4  ;;  %p239_p1 = scmp.lt.s32.totalorder %s3109_s16, 1  ;;  %p241_p3 = scmp.lt.s32.totalorder %s2742_s2, 63 }
  0x2e   : > { %v350_v3 = vand.u32 4294901760, %v333_v2 }
  0x2f   : > { %v3307_v35 = vsub.f32 %v985_v4, %v3265_v6  ;;  %s4281_s16 = smov (!%p239_p1, %s3109_s16), 1  ;;  %s4283_s2 = smov (!%p241_p3, %s2742_s2), 63 }
  0x30   : > { %v497_v5 = vsub.f32 %v333_v2, %v350_v3  ;;  %351 = vmatpush.msra.mxu0 %v350_v3  ;;  %2764 = vmatpush.msra.mxu3 %v350_v3  ;;  %s2743_s21 = sshll.u32 %s4281_s16, 6 }
  0x31   : > { %s244_s15 = sadd.s32 %s2743_s21, %s4283_s2 }
  0x32   : > { %2763 = vmatpush.msra.mxu2 %v497_v5  ;;  %584 = vmatpush.msrb.mxu0 %v497_v5  ;;  %v498_v7 = vand.u32 4294901760, %v497_v5  ;;  %s2744_s25 = sshll.u32 %s244_s15, 3 }
  0x33   : > { %s4172_s20 = scalar_lea.vmem %s4249_s3, %s2744_s25 }
  0x34   : > { %1003 = vmatpush.msrb.mxu2 %v3265_v6  ;;  %v499_v8 = vsub.f32 %v497_v5, %v498_v7 }
  0x36   : > { %v500_v9 = vand.u32 4294901760, %v499_v8 }
  0x38   : > { %501 = vmatpush.msra.mxu1 %v500_v9 }
  0x3a   : > { %682 = vmatpush.msrb.mxu1 %v350_v3 }
  0xd0   : > { %v266_v10 = vpop.trf.xlu0 }
  0xd1   : > { %v284_v11 = vsel %vm282_vm1, %v266_v10, 0 }
  0xd2   : > { %v3269_v12 = vand.u32 4294901760, %v284_v11 }
  0xd4   : > { %v3272_v13 = vsub.f32 %v284_v11, %v3269_v12  ;;  %503 = vmatmul.f32.vlgmr.msra.gmra.mxu1 %v3269_v12 }
  0xd5   : > { %880 = vmatpush.msra.mxu1 %v350_v3 }
  0xd6   : > { %v354_v14 = vand.u32 4294901760, %v3272_v13 }
  0xd8   : > { %v267_v15 = vpop.trf.xlu0  ;;  %v355_v16 = vsub.f32 %v3272_v13, %v354_v14 }
  0xd9   : > { %v287_v17 = vsel %vm282_vm1, %v267_v15, 0 }
  0xda   : > { %v3280_v18 = vand.u32 4294901760, %v287_v17  ;;  %v356_v19 = vand.u32 4294901760, %v355_v16 }
  0xdc   : > { %v3283_v20 = vsub.f32 %v287_v17, %v3280_v18  ;;  %357 = vmatmul.f32.vlgmr.msra.gmra.mxu0 %v356_v19  ;;  %507 = vmatmul.f32.gmra.mxu1 %v3280_v18 }
  0xdd   : > { %798 = vmatpush.msra.mxu0 %v498_v7 }
  0xde   : > { %v362_v21 = vand.u32 4294901760, %v3283_v20 }
  0xe0   : > { %v268_v22 = vpop.trf.xlu0  ;;  %v363_v23 = vsub.f32 %v3283_v20, %v362_v21 }
  0xe1   : > { %v290_v24 = vsel %vm282_vm1, %v268_v22, 0 }
  0xe2   : > { %v3291_v25 = vand.u32 4294901760, %v290_v24  ;;  %v364_v26 = vand.u32 4294901760, %v363_v23 }
  0xe4   : > { %v3294_v27 = vsub.f32 %v290_v24, %v3291_v25  ;;  %365 = vmatmul.f32.gmra.mxu0 %v364_v26  ;;  %511 = vmatmul.f32.gmra.mxu1 %v3291_v25 }
  0xe6   : > { %v370_v28 = vand.u32 4294901760, %v3294_v27 }
  0xe8   : > { %v269_v29 = vpop.trf.xlu0  ;;  %v371_v30 = vsub.f32 %v3294_v27, %v370_v28 }
  0xe9   : > { %v293_v31 = vsel %vm282_vm1, %v269_v29, 0 }
  0xea   : > { %v3302_v32 = vand.u32 4294901760, %v293_v31  ;;  %v372_v33 = vand.u32 4294901760, %v371_v30 }
  0xec   : > { %v377_v34 = vsub.f32 %v293_v31, %v3302_v32  ;;  %373 = vmatmul.f32.gmra.mxu0 %v372_v33  ;;  %515 = vmatmul.f32.gmra.mxu1 %v3302_v32 }
  0xee   : > { %v378_v36 = vand.u32 4294901760, %v377_v34  ;;  %602 = vmatmul.f32.vlgmr.msra.gmra.mxu2 %v377_v34 }
  0xef   : > { %1056 = vmatpush.msra.mxu2 %v3307_v35 }
  0xf0   : > { %v270_v37 = vpop.trf.xlu0  ;;  %v379_v38 = vsub.f32 %v377_v34, %v378_v36  ;;  %704 = vmatmul.f32.vlgmr.msra.gmra.mxu3 %v378_v36 }
  0xf1   : > { %v296_v39 = vsel %vm282_vm1, %v270_v37, 0 }
  0xf2   : > { %v3311_v40 = vand.u32 4294901760, %v296_v39  ;;  %v380_v41 = vand.u32 4294901760, %v379_v38 }
  0xf4   : > { %v385_v42 = vsub.f32 %v296_v39, %v3311_v40  ;;  %381 = vmatmul.f32.gmra.mxu0 %v380_v41  ;;  %519 = vmatmul.f32.gmra.mxu1 %v3311_v40 }
  0xf6   : > { %v386_v43 = vand.u32 4294901760, %v385_v42  ;;  %607 = vmatmul.f32.gmra.mxu2 %v385_v42 }
  0xf8   : > { %v271_v44 = vpop.trf.xlu0  ;;  %v387_v45 = vsub.f32 %v385_v42, %v386_v43  ;;  %710 = vmatmul.f32.gmra.mxu3 %v386_v43 }
  0xf9   : > { %v299_v46 = vsel %vm282_vm1, %v271_v44, 0 }
  0xfa   : > { %v3316_v47 = vand.u32 4294901760, %v299_v46  ;;  %v388_v48 = vand.u32 4294901760, %v387_v45 }
  0xfc   : > { %v393_v49 = vsub.f32 %v299_v46, %v3316_v47  ;;  %389 = vmatmul.f32.gmra.mxu0 %v388_v48  ;;  %523 = vmatmul.f32.gmra.mxu1 %v3316_v47 }
  0xfe   : > { %v394_v50 = vand.u32 4294901760, %v393_v49  ;;  %612 = vmatmul.f32.gmra.mxu2 %v393_v49 }
 0x100   : > { %v272_v51 = vpop.trf.xlu0  ;;  %v395_v52 = vsub.f32 %v393_v49, %v394_v50  ;;  %716 = vmatmul.f32.gmra.mxu3 %v394_v50 }
 0x101   : > { %v302_v53 = vsel %vm282_vm1, %v272_v51, 0 }
 0x102   : > { %v3321_v54 = vand.u32 4294901760, %v302_v53  ;;  %v396_v55 = vand.u32 4294901760, %v395_v52 }
 0x104   : > { %v401_v56 = vsub.f32 %v302_v53, %v3321_v54  ;;  %397 = vmatmul.f32.gmra.mxu0 %v396_v55  ;;  %527 = vmatmul.f32.gmra.mxu1 %v3321_v54 }
 0x106   : > { %v402_v57 = vand.u32 4294901760, %v401_v56  ;;  %617 = vmatmul.f32.gmra.mxu2 %v401_v56 }
 0x108   : > { %v273_v58 = vpop.trf.xlu0  ;;  %v403_v59 = vsub.f32 %v401_v56, %v402_v57  ;;  %722 = vmatmul.f32.gmra.mxu3 %v402_v57 }
 0x109   : > { %v305_v60 = vsel %vm282_vm1, %v273_v58, 0 }
 0x10a   : > { %v3326_v61 = vand.u32 4294901760, %v305_v60  ;;  %v404_v62 = vand.u32 4294901760, %v403_v59 }
 0x10c   : > { %v409_v63 = vsub.f32 %v305_v60, %v3326_v61  ;;  %405 = vmatmul.f32.gmra.mxu0 %v404_v62  ;;  %531 = vmatmul.f32.gmra.mxu1 %v3326_v61 }
 0x10e   : > { %v410_v0 = vand.u32 4294901760, %v409_v63  ;;  %622 = vmatmul.f32.gmra.mxu2 %v409_v63 }
 0x110   : > { %v274_v2 = vpop.trf.xlu0  ;;  %v411_v3 = vsub.f32 %v409_v63, %v410_v0  ;;  %728 = vmatmul.f32.gmra.mxu3 %v410_v0 }
 0x111   : > { %v308_v4 = vsel %vm282_vm1, %v274_v2, 0 }
 0x112   : > { %v3331_v5 = vand.u32 4294901760, %v308_v4  ;;  %946 = vrot.lane.b32.xlu0 %v3262_v1, %s3127_s1  ;;  %v412_v7 = vand.u32 4294901760, %v411_v3 }
 0x114   : > { %v417_v8 = vsub.f32 %v308_v4, %v3331_v5  ;;  %413 = vmatmul.f32.gmra.mxu0 %v412_v7  ;;  %535 = vmatmul.f32.gmra.mxu1 %v3331_v5 }
 0x116   : > { %v418_v9 = vand.u32 4294901760, %v417_v8  ;;  %627 = vmatmul.f32.gmra.mxu2 %v417_v8 }
 0x118   : > { %v275_v10 = vpop.trf.xlu0  ;;  %v419_v11 = vsub.f32 %v417_v8, %v418_v9  ;;  %734 = vmatmul.f32.gmra.mxu3 %v418_v9 }
 0x119   : > { %v311_v15 = vsel %vm282_vm1, %v275_v10, 0 }
 0x11a   : > { %v3337_v16 = vand.u32 4294901760, %v311_v15  ;;  %v420_v17 = vand.u32 4294901760, %v419_v11 }
 0x11c   : > { %v425_v19 = vsub.f32 %v311_v15, %v3337_v16  ;;  %421 = vmatmul.f32.gmra.mxu0 %v420_v17  ;;  %539 = vmatmul.f32.gmra.mxu1 %v3337_v16 }
 0x11e   : > { %v426_v1 = vand.u32 4294901760, %v425_v19  ;;  %632 = vmatmul.f32.gmra.mxu2 %v425_v19 }
 0x120   : > { %v276_v22 = vpop.trf.xlu0  ;;  %v427_v23 = vsub.f32 %v425_v19, %v426_v1  ;;  %740 = vmatmul.f32.gmra.mxu3 %v426_v1 }
 0x121   : > { %v314_v24 = vsel %vm282_vm1, %v276_v22, 0 }
 0x122   : > { %v3342_v26 = vand.u32 4294901760, %v314_v24  ;;  %v428_v29 = vand.u32 4294901760, %v427_v23 }
 0x124   : > { %v433_v30 = vsub.f32 %v314_v24, %v3342_v26  ;;  %429 = vmatmul.f32.gmra.mxu0 %v428_v29  ;;  %543 = vmatmul.f32.gmra.mxu1 %v3342_v26 }
 0x126   : > { %v434_v31 = vand.u32 4294901760, %v433_v30  ;;  %637 = vmatmul.f32.gmra.mxu2 %v433_v30 }
 0x128   : > { %v277_v33 = vpop.trf.xlu0  ;;  %v435_v34 = vsub.f32 %v433_v30, %v434_v31  ;;  %746 = vmatmul.f32.gmra.mxu3 %v434_v31 }
 0x129   : > { %v317_v36 = vsel %vm282_vm1, %v277_v33, 0 }
 0x12a   : > { %v3347_v37 = vand.u32 4294901760, %v317_v36  ;;  %v436_v38 = vand.u32 4294901760, %v435_v34 }
 0x12c   : > { %v441_v39 = vsub.f32 %v317_v36, %v3347_v37  ;;  %437 = vmatmul.f32.gmra.mxu0 %v436_v38  ;;  %547 = vmatmul.f32.gmra.mxu1 %v3347_v37 }
 0x12e   : > { %v442_v41 = vand.u32 4294901760, %v441_v39  ;;  %642 = vmatmul.f32.gmra.mxu2 %v441_v39 }
 0x130   : > { %v278_v42 = vpop.trf.xlu0  ;;  %v443_v43 = vsub.f32 %v441_v39, %v442_v41  ;;  %752 = vmatmul.f32.gmra.mxu3 %v442_v41 }
 0x131   : > { %v320_v44 = vsel %vm282_vm1, %v278_v42, 0 }
 0x132   : > { %v3352_v45 = vand.u32 4294901760, %v320_v44  ;;  %v444_v46 = vand.u32 4294901760, %v443_v43 }
 0x134   : > { %v449_v48 = vsub.f32 %v320_v44, %v3352_v45  ;;  %445 = vmatmul.f32.gmra.mxu0 %v444_v46  ;;  %551 = vmatmul.f32.gmra.mxu1 %v3352_v45 }
 0x136   : > { %v450_v49 = vand.u32 4294901760, %v449_v48  ;;  %647 = vmatmul.f32.gmra.mxu2 %v449_v48 }
 0x138   : > { %v279_v50 = vpop.trf.xlu0  ;;  %v451_v51 = vsub.f32 %v449_v48, %v450_v49  ;;  %758 = vmatmul.f32.gmra.mxu3 %v450_v49 }
 0x139   : > { %v323_v52 = vsel %vm282_vm1, %v279_v50, 0 }
 0x13a   : > { %v3357_v53 = vand.u32 4294901760, %v323_v52  ;;  %v452_v55 = vand.u32 4294901760, %v451_v51  ;;  %v3128_v51 = vmov 16  }
 0x13b   : > { %2863 = vset.pattern.permute.xlu2 %v3128_v51  ;;  %2864 = vset.pattern.permute.xlu0 %v3128_v51 }
 0x13c   : > { %v457_v56 = vsub.f32 %v323_v52, %v3357_v53  ;;  %453 = vmatmul.f32.gmra.mxu0 %v452_v55  ;;  %555 = vmatmul.f32.gmra.mxu1 %v3357_v53 }
 0x13e   : > { %v458_v57 = vand.u32 4294901760, %v457_v56  ;;  %652 = vmatmul.f32.gmra.mxu2 %v457_v56 }
 0x140   : > { %v280_v58 = vpop.trf.xlu0  ;;  %v459_v59 = vsub.f32 %v457_v56, %v458_v57  ;;  %764 = vmatmul.f32.gmra.mxu3 %v458_v57 }
 0x141   : > { %v326_v60 = vsel %vm282_vm1, %v280_v58, 0 }
 0x142   : > { %v3362_v62 = vand.u32 4294901760, %v326_v60  ;;  %v460_v63 = vand.u32 4294901760, %v459_v59 }
 0x144   : > { %v465_v0 = vsub.f32 %v326_v60, %v3362_v62  ;;  %461 = vmatmul.f32.gmra.mxu0 %v460_v63  ;;  %559 = vmatmul.f32.gmra.mxu1 %v3362_v62 }
 0x146   : > { %v466_v2 = vand.u32 4294901760, %v465_v0  ;;  %657 = vmatmul.f32.gmra.mxu2 %v465_v0 }
 0x148   : > { %v281_v3 = vpop.trf.xlu0  ;;  %v467_v4 = vsub.f32 %v465_v0, %v466_v2  ;;  %770 = vmatmul.f32.gmra.mxu3 %v466_v2 }
 0x149   : > { %v329_v7 = vsel %vm282_vm1, %v281_v3, 0 }
 0x14a   : > { %v3367_v8 = vand.u32 4294901760, %v329_v7  ;;  %v468_v9 = vand.u32 4294901760, %v467_v4 }
 0x14c   : > { %v473_v10 = vsub.f32 %v329_v7, %v3367_v8  ;;  %469 = vmatmul.f32.gmra.mxu0 %v468_v9  ;;  %563 = vmatmul.f32.gmra.mxu1 %v3367_v8 }
 0x14e   : > { %v474_v11 = vand.u32 4294901760, %v473_v10  ;;  %662 = vmatmul.f32.gmra.mxu2 %v473_v10 }
 0x150   : > { %v475_v15 = vsub.f32 %v473_v10, %v474_v11  ;;  %776 = vmatmul.f32.gmra.mxu3 %v474_v11 }
 0x151   : > { %v3371_v17 = vpop.f32.mrf.mxu1 }
 0x152   : > { %v476_v19 = vand.u32 4294901760, %v475_v15 }
 0x154   : > { %477 = vmatmul.f32.gmra.mxu0 %v476_v19  ;;  %686 = vmatmul.f32.vlgmr.msrb.gmra.mxu1 %v354_v14 }
 0x159   : > { %v3375_v1 = vpop.f32.mrf.mxu0  ;;  %v3377_v22 = vpop.f32.mrf.mxu1 }
 0x15a   : > { %v505_v58 = vadd.f32 %v3371_v17, %v3375_v1 }
 0x15c   : > { %587 = vmatmul.f32.vlgmr.msrb.gmra.mxu0 %v3272_v13  ;;  %692 = vmatmul.f32.gmra.mxu1 %v362_v21 }
 0x161   : > { %v3382_v23 = vpop.f32.mrf.mxu0  ;;  %v3384_v24 = vpop.f32.mrf.mxu1 }
 0x162   : > { %v509_v2 = vadd.f32 %v3377_v22, %v3382_v23 }
 0x164   : > { %592 = vmatmul.f32.gmra.mxu0 %v3283_v20  ;;  %698 = vmatmul.f32.gmra.mxu1 %v370_v28 }
 0x169   : > { %v3389_v29 = vpop.f32.mrf.mxu0  ;;  %v3391_v14 = vpop.f32.mrf.mxu1 }
 0x16c   : > { %597 = vmatmul.f32.gmra.mxu0 %v3294_v27  ;;  %882 = vmatmul.f32.vlgmr.msra.gmra.mxu1 %v3269_v12 }
 0x171   : > { %v3395_v13 = vpop.f32.mrf.mxu0  ;;  %v3397_v21 = vpop.f32.mrf.mxu1 }
 0x172   : > { %v603_v56 = vpop.f32.mrf.mxu2  ;;  %v517_v22 = vadd.f32 %v3391_v14, %v3395_v13 }
 0x173   : > { %v705_v59 = vpop.f32.mrf.mxu3 }
 0x174   : > { %800 = vmatmul.f32.vlgmr.msra.gmra.mxu0 %v3269_v12  ;;  %886 = vmatmul.f32.gmra.mxu1 %v3280_v18 }
 0x179   : > { %v3401_v20 = vpop.f32.mrf.mxu0  ;;  %v3403_v30 = vpop.f32.mrf.mxu1 }
 0x17a   : > { %v608_v3 = vpop.f32.mrf.mxu2 }
 0x17b   : > { %v711_v9 = vpop.f32.mrf.mxu3 }
 0x17c   : > { %804 = vmatmul.f32.gmra.mxu0 %v3280_v18  ;;  %890 = vmatmul.f32.gmra.mxu1 %v3291_v25 }
 0x181   : > { %v3407_v28 = vpop.f32.mrf.mxu0  ;;  %v3409_v27 = vpop.f32.mrf.mxu1 }
 0x182   : > { %v613_v19 = vpop.f32.mrf.mxu2 }
 0x183   : > { %v717_v23 = vpop.f32.mrf.mxu3 }
 0x184   : > { %808 = vmatmul.f32.gmra.mxu0 %v3291_v25  ;;  %894 = vmatmul.f32.gmra.mxu1 %v3302_v32  ;;  %v947_v31 = vpop.permute.xlu0 %946 }
 0x185   : > { %949 = vxpose.xlu1.b32.start.end [1/1] (short) (narrow) %v947_v31, 8 }
 0x189   : > { %v3413_v12 = vpop.f32.mrf.mxu0  ;;  %v3415_v33 = vpop.f32.mrf.mxu1 }
 0x18c   : > { %812 = vmatmul.f32.gmra.mxu0 %v3302_v32  ;;  %898 = vmatmul.f32.gmra.mxu1 %v3311_v40 }
 0x191   : > { %v3419_v18 = vpop.f32.mrf.mxu0  ;;  %v3421_v34 = vpop.f32.mrf.mxu1 }
 0x194   : > { %816 = vmatmul.f32.gmra.mxu0 %v3311_v40  ;;  %902 = vmatmul.f32.gmra.mxu1 %v3316_v47 }
 0x199   : > { %v3425_v25 = vpop.f32.mrf.mxu0  ;;  %v3427_v36 = vpop.f32.mrf.mxu1 }
 0x19c   : > { %820 = vmatmul.f32.gmra.mxu0 %v3316_v47  ;;  %906 = vmatmul.f32.gmra.mxu1 %v3321_v54  ;;  %v1030_v47 = vand.u32 4294901760, %v3307_v35 }
 0x19e   : > { %v1031_v41 = vsub.f32 %v3307_v35, %v1030_v47 }
 0x1a0   : > { %v1032_v42 = vand.u32 4294901760, %v1031_v41 }
 0x1a1   : > { %v3431_v38 = vpop.f32.mrf.mxu0  ;;  %v3433_v32 = vpop.f32.mrf.mxu1 }
 0x1a2   : > { %1033 = vmatpush.msrb.mxu3 %v1032_v42 }
 0x1a4   : > { %824 = vmatmul.f32.gmra.mxu0 %v3321_v54  ;;  %910 = vmatmul.f32.gmra.mxu1 %v3326_v61 }
 0x1a5   : > { %1079 = vmatpush.msra.mxu3 %v3265_v6 }
 0x1a9   : > { %v3437_v39 = vpop.f32.mrf.mxu0  ;;  %v3439_v40 = vpop.f32.mrf.mxu1 }
 0x1ac   : > { %828 = vmatmul.f32.gmra.mxu0 %v3326_v61  ;;  %914 = vmatmul.f32.gmra.mxu1 %v3331_v5 }
 0x1b1   : > { %v3447_v43 = vpop.f32.mrf.mxu0  ;;  %v3449_v54 = vpop.f32.mrf.mxu1 }
 0x1b4   : > { %832 = vmatmul.f32.gmra.mxu0 %v3331_v5  ;;  %918 = vmatmul.f32.gmra.mxu1 %v3337_v16 }
 0x1b9   : > { %v3454_v61 = vpop.f32.mrf.mxu0  ;;  %v3456_v44 = vpop.f32.mrf.mxu1 }
 0x1bc   : > { %836 = vmatmul.f32.gmra.mxu0 %v3337_v16  ;;  %922 = vmatmul.f32.gmra.mxu1 %v3342_v26 }
 0x1c1   : > { %v3460_v46 = vpop.f32.mrf.mxu0  ;;  %v3462_v48 = vpop.f32.mrf.mxu1 }
 0x1c4   : > { %840 = vmatmul.f32.gmra.mxu0 %v3342_v26  ;;  %926 = vmatmul.f32.gmra.mxu1 %v3347_v37 }
 0x1c9   : > { %v3466_v49 = vpop.f32.mrf.mxu0  ;;  %v3468_v5 = vpop.f32.mrf.mxu1 }
 0x1cc   : > { %844 = vmatmul.f32.gmra.mxu0 %v3347_v37  ;;  %930 = vmatmul.f32.gmra.mxu1 %v3352_v45 }
 0x1d1   : > { %v3472_v50 = vpop.f32.mrf.mxu0  ;;  %v687_v16 = vpop.f32.mrf.mxu1 }
 0x1d4   : > { %848 = vmatmul.f32.gmra.mxu0 %v3352_v45  ;;  %934 = vmatmul.f32.gmra.mxu1 %v3357_v53 }
 0x1d8   : > { %2862 = vset.pattern.permute.xlu1 %v3128_v51 }
 0x1d9   : > { %v588_v26 = vpop.f32.mrf.mxu0  ;;  %v693_v52 = vpop.f32.mrf.mxu1 }
 0x1da   : > { %v589_v60 = vadd.f32 %v588_v26, %v505_v58  ;;  %v604_v26 = vadd.f32 %v603_v56, %v517_v22  ;;  %v723_v58 = vpop.f32.mrf.mxu3 }
 0x1dc   : > { %852 = vmatmul.f32.gmra.mxu0 %v3357_v53  ;;  %938 = vmatmul.f32.gmra.mxu1 %v3362_v62  ;;  %v688_v63 = vadd.f32 %v687_v16, %v589_v60 }
 0x1e1   : > { %v593_v37 = vpop.f32.mrf.mxu0  ;;  %v699_v55 = vpop.f32.mrf.mxu1 }
 0x1e2   : > { %v594_v4 = vadd.f32 %v593_v37, %v509_v2  ;;  %v618_v37 = vpop.f32.mrf.mxu2 }
 0x1e4   : > { %856 = vmatmul.f32.gmra.mxu0 %v3362_v62  ;;  %942 = vmatmul.f32.gmra.mxu1 %v3367_v8  ;;  %v694_v10 = vadd.f32 %v693_v52, %v594_v4 }
 0x1e9   : > { %v598_v45 = vpop.f32.mrf.mxu0  ;;  %v883_v57 = vpop.f32.mrf.mxu1 }
 0x1ec   : > { %860 = vmatmul.f32.gmra.mxu0 %v3367_v8  ;;  %v513_v8 = vadd.f32 %v3384_v24, %v3389_v29  ;;  %v521_v24 = vadd.f32 %v3397_v21, %v3401_v20  ;;  %v706_v29 = vadd.f32 %v705_v59, %v604_v26  ;;  %v729_v21 = vpop.f32.mrf.mxu3  ;;  %v529_v59 = vadd.f32 %v3409_v27, %v3413_v12 }
 0x1ee   : > { %v599_v1 = vadd.f32 %v598_v45, %v513_v8  ;;  %v609_v14 = vadd.f32 %v608_v3, %v521_v24  ;;  %v533_v8 = vadd.f32 %v3415_v33, %v3419_v18 }
 0x1f0   : > { %v700_v41 = vadd.f32 %v699_v55, %v599_v1  ;;  %v525_v55 = vadd.f32 %v3403_v30, %v3407_v28  ;;  %v712_v56 = vadd.f32 %v711_v9, %v609_v14  ;;  %v619_v30 = vadd.f32 %v618_v37, %v529_v59 }
 0x1f1   : > { %v801_v53 = vpop.f32.mrf.mxu0  ;;  %v887_v0 = vpop.f32.mrf.mxu1 }
 0x1f2   : > { %v802_v62 = vadd.f32 %v801_v53, %v688_v63  ;;  %v623_v63 = vpop.f32.mrf.mxu2 }
 0x1f4   : > { %v3485_v7 = vadd.f32 %v883_v57, %v802_v62  ;;  %v614_v62 = vadd.f32 %v613_v19, %v525_v55  ;;  %v735_v9 = vpop.f32.mrf.mxu3 }
 0x1f6   : > { %1135 = vperm.xlu1 %2862, %v3485_v7   ;;  %v718_v3 = vadd.f32 %v717_v23, %v614_v62  ;;  %v537_v23 = vadd.f32 %v3421_v34, %v3425_v25  ;;  %v541_v34 = vadd.f32 %v3427_v36, %v3431_v38 }
 0x1f9   : > { %v805_v11 = vpop.f32.mrf.mxu0  ;;  %v891_v15 = vpop.f32.mrf.mxu1 }
 0x1fa   : > { %v806_v17 = vadd.f32 %v805_v11, %v694_v10  ;;  %v628_v11 = vpop.f32.mrf.mxu2 }
 0x1fb   : > { %v629_v18 = vadd.f32 %v628_v11, %v537_v23 }
 0x1fc   : > { %v3490_v31 = vadd.f32 %v887_v0, %v806_v17  ;;  %v724_v17 = vadd.f32 %v723_v58, %v619_v30 }
 0x1fd   : > { %v736_v25 = vadd.f32 %v735_v9, %v629_v18 }
 0x1fe   : > { %1140 = vperm.xlu2 %2863, %v3490_v31  }
 0x201   : > { %v809_v42 = vpop.f32.mrf.mxu0  ;;  %v895_v16 = vpop.f32.mrf.mxu1 }
 0x202   : > { %v810_v51 = vadd.f32 %v809_v42, %v700_v41  ;;  %v624_v41 = vadd.f32 %v623_v63, %v533_v8  ;;  %v633_v27 = vpop.f32.mrf.mxu2 }
 0x204   : > { %v3495_v52 = vadd.f32 %v891_v15, %v810_v51  ;;  %v730_v42 = vadd.f32 %v729_v21, %v624_v41 }
 0x206   : > { %1145 = vperm.xlu2 %2863, %v3495_v52  }
 0x209   : > { %v813_v45 = vpop.f32.mrf.mxu0  ;;  %v899_v57 = vpop.f32.mrf.mxu1 }
 0x20a   : > { %v814_v60 = vadd.f32 %v813_v45, %v706_v29 }
 0x20c   : > { %v3500_v13 = vadd.f32 %v895_v16, %v814_v60  ;;  %v741_v16 = vpop.f32.mrf.mxu3 }
 0x20e   : > { %1150 = vperm.xlu2 %2863, %v3500_v13  }
 0x211   : > { %v817_v53 = vpop.f32.mrf.mxu0  ;;  %v903_v0 = vpop.f32.mrf.mxu1 }
 0x212   : > { %v818_v2 = vadd.f32 %v817_v53, %v712_v56 }
 0x214   : > { %v3505_v20 = vadd.f32 %v899_v57, %v818_v2  ;;  %v3523_v57 = vpop.f32.mrf.mxu2  ;;  %v747_v53 = vpop.f32.mrf.mxu3 }
 0x216   : > { %1155 = vperm.xlu2 %2863, %v3505_v20  }
 0x219   : > { %v821_v4 = vpop.f32.mrf.mxu0  ;;  %v907_v10 = vpop.f32.mrf.mxu1 }
 0x21a   : > { %v822_v15 = vadd.f32 %v821_v4, %v718_v3 }
 0x21c   : > { %v3510_v28 = vadd.f32 %v903_v0, %v822_v15  ;;  %v634_v0 = vadd.f32 %v633_v27, %v541_v34  ;;  %v643_v36 = vpop.f32.mrf.mxu2  ;;  %v753_v4 = vpop.f32.mrf.mxu3 }
 0x21e   : > { %1160 = vperm.xlu2 %2863, %v3510_v28  }
 0x221   : > { %v825_v19 = vpop.f32.mrf.mxu0  ;;  %v911_v1 = vpop.f32.mrf.mxu1 }
 0x222   : > { %v826_v22 = vadd.f32 %v825_v19, %v724_v17 }
 0x224   : > { %v3515_v12 = vadd.f32 %v907_v10, %v826_v22  ;;  %v549_v10 = vadd.f32 %v3439_v40, %v3447_v43  ;;  %v648_v15 = vpop.f32.mrf.mxu2  ;;  %v557_v40 = vadd.f32 %v3456_v44, %v3460_v46  ;;  %v561_v43 = vadd.f32 %v3462_v48, %v3466_v49 }
 0x226   : > { %1165 = vperm.xlu2 %2863, %v3515_v12   ;;  %v644_v35 = vadd.f32 %v643_v36, %v549_v10 }
 0x228   : > { %v754_v9 = vadd.f32 %v753_v4, %v644_v35 }
 0x229   : > { %v829_v51 = vpop.f32.mrf.mxu0  ;;  %v915_v26 = vpop.f32.mrf.mxu1 }
 0x22a   : > { %v830_v37 = vadd.f32 %v829_v51, %v730_v42  ;;  %v965_v24 = vpop.trf.xlu1  ;;  %v553_v51 = vadd.f32 %v3449_v54, %v3454_v61 }
 0x22b   : > { %v982_v33 = vsel %vm282_vm1, %v965_v24, 0 }
 0x22c   : > { %v3521_v29 = vadd.f32 %v911_v1, %v830_v37  ;;  %v1004_v45 = vand.u32 4294901760, %v982_v33  ;;  %v653_v19 = vpop.f32.mrf.mxu2  ;;  %v649_v18 = vadd.f32 %v648_v15, %v553_v51 }
 0x22d   : > { %v654_v37 = vadd.f32 %v653_v19, %v557_v40 }
 0x22e   : > { %v1005_v58 = vsub.f32 %v982_v33, %v1004_v45  ;;  %1035 = vmatmul.f32.vlgmr.msrb.gmra.mxu3 %v1004_v45  ;;  %1170 = vperm.xlu2 %2863, %v3521_v29   ;;  %v545_v33 = vadd.f32 %v3433_v32, %v3437_v39 }
 0x22f   : > { %1127 = vmatpush.msrb.mxu3 %v3265_v6  ;;  %v742_v6 = vadd.f32 %v741_v16, %v634_v0 }
 0x230   : > { %v1006_v60 = vand.u32 4294901760, %v1005_v58  ;;  %v639_v48 = vadd.f32 %v3523_v57, %v545_v33 }
 0x231   : > { %v833_v14 = vpop.f32.mrf.mxu0  ;;  %v919_v55 = vpop.f32.mrf.mxu1 }
 0x232   : > { %v834_v56 = vadd.f32 %v833_v14, %v736_v25  ;;  %v1007_v63 = vsub.f32 %v1005_v58, %v1006_v60  ;;  %v748_v32 = vadd.f32 %v747_v53, %v639_v48 }
 0x234   : > { %v3529_v2 = vadd.f32 %v915_v26, %v834_v56  ;;  %v1008_v62 = vand.u32 4294901760, %v1007_v63  ;;  %v658_v23 = vpop.f32.mrf.mxu2 }
 0x235   : > { %v659_v24 = vadd.f32 %v658_v23, %v561_v43 }
 0x236   : > { %1009 = vmatmul.f32.vlgmr.msrb.gmra.mxu2 %v1008_v62  ;;  %1083 = vmatmul.f32.vlgmr.msra.gmra.mxu3 %v1006_v60 }
 0x237   : > { %1175 = vperm.xlu1 %2862, %v3529_v2   ;;  %1105 = vmatpush.msrb.mxu2 %v1030_v47  ;;  %v759_v47 = vpop.f32.mrf.mxu3 }
 0x238   : > { %v760_v49 = vadd.f32 %v759_v47, %v649_v18  ;;  %v3653_v18 = vand.u32 4294901760, %v3510_v28 }
 0x239   : > { %v837_v38 = vpop.f32.mrf.mxu0  ;;  %v923_v21 = vpop.f32.mrf.mxu1 }
 0x23a   : > { %v838_v59 = vadd.f32 %v837_v38, %v742_v6 }
 0x23c   : > { %v3534_v3 = vadd.f32 %v919_v55, %v838_v59  ;;  %v663_v44 = vpop.f32.mrf.mxu2 }
 0x23e   : > { %1059 = vmatmul.f32.vlgmr.msra.gmra.mxu2 %v1005_v58  ;;  %1129 = vmatmul.f32.vlgmr.msrb.gmra.mxu3 %v1004_v45 }
 0x23f   : > { %1180 = vperm.xlu2 %2863, %v3534_v3   ;;  %v765_v41 = vpop.f32.mrf.mxu3 }
 0x240   : > { %v766_v58 = vadd.f32 %v765_v41, %v654_v37 }
 0x241   : > { %v841_v11 = vpop.f32.mrf.mxu0  ;;  %v927_v30 = vpop.f32.mrf.mxu1 }
 0x246   : > { %1107 = vmatmul.f32.vlgmr.msrb.gmra.mxu2 %v1004_v45  ;;  %v565_v45 = vadd.f32 %v3468_v5, %v3472_v50  ;;  %v842_v5 = vadd.f32 %v841_v11, %v748_v32 }
 0x247   : > { %v771_v26 = vpop.f32.mrf.mxu3 }
 0x248   : > { %v772_v34 = vadd.f32 %v771_v26, %v659_v24  ;;  %v664_v61 = vadd.f32 %v663_v44, %v565_v45  ;;  %v3562_v38 = vadd.f32 %v923_v21, %v842_v5  ;;  %v3639_v26 = vand.u32 4294901760, %v3515_v12 }
 0x249   : > { %v845_v8 = vpop.f32.mrf.mxu0  ;;  %v931_v22 = vpop.f32.mrf.mxu1  ;;  %v3667_v44 = vand.u32 4294901760, %v3505_v20  ;;  %v3709_v5 = vand.u32 4294901760, %v3490_v31 }
 0x24a   : > { %v846_v17 = vadd.f32 %v845_v8, %v754_v9  ;;  %v3583_v21 = vand.u32 4294901760, %v3562_v38  ;;  %v3597_v9 = vand.u32 4294901760, %v3534_v3 }
 0x24c   : > { %v928_v1 = vadd.f32 %v927_v30, %v846_v17 }
 0x24e   : > { %1190 = vperm.xlu1 %2862, %v928_v1   ;;  %v3573_v10 = vand.u32 4294901760, %v928_v1 }
 0x24f   : > { %v777_v56 = vpop.f32.mrf.mxu3 }
 0x250   : > { %v778_v63 = vadd.f32 %v777_v56, %v664_v61  ;;  %v3603_v17 = vsub.f32 %v928_v1, %v3573_v10 }
 0x251   : > { %v849_v27 = vpop.f32.mrf.mxu0  ;;  %v935_v42 = vpop.f32.mrf.mxu1 }
 0x252   : > { %v850_v14 = vadd.f32 %v849_v27, %v760_v49  ;;  %v3620_v27 = vsub.f32 %v3562_v38, %v3583_v21  ;;  %v1881_v51 = vand.u32 4294901760, %v3603_v17  ;;  %v3681_v49 = vand.u32 4294901760, %v3500_v13 }
 0x254   : > { %v3554_v50 = vadd.f32 %v931_v22, %v850_v14  ;;  %v3607_v22 = vand.u32 4294901760, %v3529_v2  ;;  %v3695_v14 = vand.u32 4294901760, %v3495_v52 }
 0x256   : > { %v3565_v59 = vand.u32 4294901760, %v3554_v50  ;;  %v3647_v33 = vsub.f32 %v3529_v2, %v3607_v22 }
 0x258   : > { %v3593_v35 = vsub.f32 %v3554_v50, %v3565_v59  ;;  %v1899_v48 = vand.u32 4294901760, %v3647_v33 }
 0x259   : > { %v853_v16 = vpop.f32.mrf.mxu0  ;;  %v939_v46 = vpop.f32.mrf.mxu1 }
 0x25a   : > { %v854_v60 = vadd.f32 %v853_v16, %v766_v58  ;;  %v1875_v23 = vand.u32 4294901760, %v3593_v35  ;;  %v3634_v16 = vsub.f32 %v3534_v3, %v3597_v9  ;;  %v1887_v3 = vand.u32 4294901760, %v3620_v27 }
 0x25b   : > { %v1882_v58 = vsub.f32 %v3603_v17, %v1881_v51  ;;  %v1900_v32 = vsub.f32 %v3647_v33, %v1899_v48 }
 0x25c   : > { %v3552_v39 = vadd.f32 %v935_v42, %v854_v60  ;;  %v3625_v42 = vand.u32 4294901760, %v3521_v29  ;;  %v1876_v24 = vsub.f32 %v3593_v35, %v1875_v23 }
 0x25d   : > { %v1883_v60 = vand.u32 4294901760, %v1882_v58 }
 0x25e   : > { %v3560_v57 = vand.u32 4294901760, %v3552_v39  ;;  %v3661_v2 = vsub.f32 %v3521_v29, %v3625_v42  ;;  %v3675_v29 = vsub.f32 %v3515_v12, %v3639_v26  ;;  %v3689_v12 = vsub.f32 %v3510_v28, %v3653_v18 }
 0x25f   : > { %v3703_v28 = vsub.f32 %v3505_v20, %v3667_v44  ;;  %v3717_v20 = vsub.f32 %v3500_v13, %v3681_v49  ;;  %v3731_v13 = vsub.f32 %v3495_v52, %v3695_v14 }
 0x260   : > { %v3580_v15 = vsub.f32 %v3552_v39, %v3560_v57  ;;  %v1905_v61 = vand.u32 4294901760, %v3661_v2 }
 0x261   : > { %v857_v25 = vpop.f32.mrf.mxu0  ;;  %v943_v36 = vpop.f32.mrf.mxu1  ;;  %v1929_v52 = vand.u32 4294901760, %v3717_v20 }
 0x262   : > { %v858_v54 = vadd.f32 %v857_v25, %v772_v34  ;;  %v1869_v19 = vand.u32 4294901760, %v3580_v15  ;;  %v1893_v34 = vand.u32 4294901760, %v3634_v16  ;;  %v1888_v25 = vsub.f32 %v3620_v27, %v1887_v3 }
 0x264   : > { %v3550_v55 = vadd.f32 %v939_v46, %v858_v54  ;;  %v1870_v43 = vsub.f32 %v3580_v15, %v1869_v19  ;;  %v1877_v46 = vand.u32 4294901760, %v1876_v24  ;;  %v1894_v54 = vsub.f32 %v3634_v16, %v1893_v34 }
 0x265   : > { %v1889_v56 = vand.u32 4294901760, %v1888_v25 }
 0x266   : > { %v3557_v0 = vand.u32 4294901760, %v3550_v55  ;;  %v1871_v45 = vand.u32 4294901760, %v1870_v43  ;;  %v1923_v43 = vand.u32 4294901760, %v3703_v28 }
 0x268   : > { %v3571_v4 = vsub.f32 %v3550_v55, %v3557_v0 }
 0x269   : > { %v861_v62 = vpop.f32.mrf.mxu0 }
 0x26a   : > { %v862_v6 = vadd.f32 %v861_v62, %v778_v63  ;;  %v1863_v47 = vand.u32 4294901760, %v3571_v4  ;;  %v1911_v63 = vand.u32 4294901760, %v3675_v29  ;;  %v1895_v62 = vand.u32 4294901760, %v1894_v54 }
 0x26b   : > { %v1930_v54 = vsub.f32 %v3717_v20, %v1929_v52 }
 0x26c   : > { %v3567_v53 = vadd.f32 %v943_v36, %v862_v6  ;;  %v1864_v1 = vsub.f32 %v3571_v4, %v1863_v47  ;;  %v1906_v6 = vsub.f32 %v3661_v2, %v1905_v61  ;;  %v1917_v36 = vand.u32 4294901760, %v3689_v12 }
 0x26e   : > { %v3576_v11 = vand.u32 4294901760, %v3567_v53  ;;  %v1865_v37 = vand.u32 4294901760, %v1864_v1  ;;  %v1901_v1 = vand.u32 4294901760, %v1900_v32  ;;  %v1918_v24 = vsub.f32 %v3689_v12, %v1917_v36 }
 0x270   : > { %v3587_v30 = vsub.f32 %v3567_v53, %v3576_v11  ;;  %1695 = vmatpush.msra.mxu2 %v3576_v11  ;;  %2146 = vmatpush.msrb.mxu1 %v3576_v11 }
 0x272   : > { %1697 = vmatpush.msra.mxu2 %v3557_v0  ;;  %2018 = vmatpush.msrb.mxu0 %v3587_v30  ;;  %v1857_v8 = vand.u32 4294901760, %v3587_v30 }
 0x273   : > { %2148 = vmatpush.msrb.mxu1 %v3557_v0 }
 0x274   : > { %1699 = vmatpush.msra.mxu2 %v3560_v57  ;;  %2021 = vmatpush.msrb.mxu0 %v3571_v4  ;;  %v1858_v41 = vsub.f32 %v3587_v30, %v1857_v8 }
 0x275   : > { %2150 = vmatpush.msrb.mxu1 %v3560_v57 }
 0x276   : > { %1701 = vmatpush.msra.mxu2 %v3565_v59  ;;  %2024 = vmatpush.msrb.mxu0 %v3580_v15  ;;  %v1859_v40 = vand.u32 4294901760, %v1858_v41  ;;  %v3723_v41 = vand.u32 4294901760, %v3485_v7 }
 0x277   : > { %2152 = vmatpush.msrb.mxu1 %v3565_v59 }
 0x278   : > { %1703 = vmatpush.msra.mxu2 %v3573_v10  ;;  %1860 = vmatpush.msra.mxu3 %v1859_v40  ;;  %v1912_v40 = vsub.f32 %v3675_v29, %v1911_v63  ;;  %v1946_v25 = vsub.f32 %v3485_v7, %v3723_v41 }
 0x279   : > { %2027 = vmatpush.msrb.mxu0 %v3593_v35  ;;  %2154 = vmatpush.msrb.mxu1 %v3573_v10 }
 0x27a   : > { %1705 = vmatpush.msra.mxu2 %v3583_v21  ;;  %1866 = vmatpush.msra.mxu3 %v1865_v37  ;;  %v1907_v37 = vand.u32 4294901760, %v1906_v6  ;;  %v1913_v58 = vand.u32 4294901760, %v1912_v40  ;;  %v1931_v6 = vand.u32 4294901760, %v1930_v54  ;;  %v1284_v54 = vld [vmem:[#allocation4 + $0x30] sm:$0xff] }
 0x27b   : > { %2030 = vmatpush.msrb.mxu0 %v3603_v17  ;;  %2156 = vmatpush.msrb.mxu1 %v3583_v21  ;;  %vm1300_vm14 = vcmp.gt.f32.partialorder %v1284_v54, 0.0 }
 0x27c   : > { %1707 = vmatpush.msra.mxu2 %v3597_v9  ;;  %1872 = vmatpush.msra.mxu3 %v1871_v45  ;;  %v3742_v45 = vsub.f32 %v3490_v31, %v3709_v5  ;;  %v1935_v31 = vand.u32 4294901760, %v3731_v13 }
 0x27d   : > { %2033 = vmatpush.msrb.mxu0 %v3620_v27  ;;  %2158 = vmatpush.msrb.mxu1 %v3597_v9 }
 0x27e   : > { %1709 = vmatpush.msra.mxu2 %v3607_v22  ;;  %1878 = vmatpush.msra.mxu3 %v1877_v46  ;;  %v1924_v46 = vsub.f32 %v3703_v28, %v1923_v43  ;;  %v1936_v32 = vsub.f32 %v3731_v13, %v1935_v31 }
 0x27f   : > { %2036 = vmatpush.msrb.mxu0 %v3634_v16  ;;  %2160 = vmatpush.msrb.mxu1 %v3607_v22 }
 0x280   : > { %1711 = vmatpush.msra.mxu2 %v3625_v42  ;;  %1884 = vmatpush.msra.mxu3 %v1883_v60  ;;  %v1919_v60 = vand.u32 4294901760, %v1918_v24  ;;  %v1925_v7 = vand.u32 4294901760, %v1924_v46 }
 0x281   : > { %2039 = vmatpush.msrb.mxu0 %v3647_v33  ;;  %2162 = vmatpush.msrb.mxu1 %v3625_v42 }
 0x282   : > { %1713 = vmatpush.msra.mxu2 %v3639_v26  ;;  %1890 = vmatpush.msra.mxu3 %v1889_v56  ;;  %v1941_v56 = vand.u32 4294901760, %v3742_v45 }
 0x283   : > { %2042 = vmatpush.msrb.mxu0 %v3661_v2  ;;  %2164 = vmatpush.msrb.mxu1 %v3639_v26 }
 0x284   : > { %1715 = vmatpush.msra.mxu2 %v3653_v18  ;;  %1896 = vmatpush.msra.mxu3 %v1895_v62  ;;  %v1947_v62 = vand.u32 4294901760, %v1946_v25 }
 0x285   : > { %2045 = vmatpush.msrb.mxu0 %v3675_v29  ;;  %2166 = vmatpush.msrb.mxu1 %v3653_v18 }
 0x286   : > { %1717 = vmatpush.msra.mxu2 %v3667_v44  ;;  %1902 = vmatpush.msra.mxu3 %v1901_v1  ;;  %v1942_v1 = vsub.f32 %v3742_v45, %v1941_v56  ;;  %v1948_v40 = vsub.f32 %v1946_v25, %v1947_v62 }
 0x287   : > { %2048 = vmatpush.msrb.mxu0 %v3689_v12  ;;  %2168 = vmatpush.msrb.mxu1 %v3667_v44 }
 0x288   : > { %1719 = vmatpush.msra.mxu2 %v3681_v49  ;;  %1908 = vmatpush.msra.mxu3 %v1907_v37  ;;  %v1949_v37 = vand.u32 4294901760, %v1948_v40 }
 0x289   : > { %2051 = vmatpush.msrb.mxu0 %v3703_v28  ;;  %2170 = vmatpush.msrb.mxu1 %v3681_v49 }
 0x28a   : > { %1721 = vmatpush.msra.mxu2 %v3695_v14  ;;  %1914 = vmatpush.msra.mxu3 %v1913_v58 }
 0x28b   : > { %2054 = vmatpush.msrb.mxu0 %v3717_v20  ;;  %2172 = vmatpush.msrb.mxu1 %v3695_v14  ;;  %v1937_v20 = vand.u32 4294901760, %v1936_v32 }
 0x28c   : > { %1723 = vmatpush.msra.mxu2 %v3709_v5  ;;  %1920 = vmatpush.msra.mxu3 %v1919_v60 }
 0x28d   : > { %2057 = vmatpush.msrb.mxu0 %v3731_v13  ;;  %2174 = vmatpush.msrb.mxu1 %v3709_v5  ;;  %v1943_v13 = vand.u32 4294901760, %v1942_v1 }
 0x28e   : > { %1725 = vmatpush.msra.mxu2 %v3723_v41  ;;  %1926 = vmatpush.msra.mxu3 %v1925_v7  ;;  %v1281_v7 = vld [vmem:[#allocation4 + $0x18] sm:$0xff] }
 0x28f   : > { %2060 = vmatpush.msrb.mxu0 %v3742_v45  ;;  %2176 = vmatpush.msrb.mxu1 %v3723_v41  ;;  %vm1297_vm15 = vcmp.gt.f32.partialorder %v1281_v7, 0.0 }
 0x290   : > { %2277 = vmatpush.msrb.mxu2 %v1857_v8  ;;  %1932 = vmatpush.msra.mxu3 %v1931_v6 }
 0x291   : > { %2063 = vmatpush.msrb.mxu0 %v1946_v25 }
 0x292   : > { %2281 = vmatpush.msrb.mxu2 %v1863_v47  ;;  %1938 = vmatpush.msra.mxu3 %v1937_v20  ;;  %v1136_v47 = vpop.permute.xlu1 %1135 }
 0x294   : > { %2285 = vmatpush.msrb.mxu2 %v1869_v19  ;;  %1944 = vmatpush.msra.mxu3 %v1943_v13  ;;  %v1283_v13 = vld [vmem:[#allocation4 + $0x28] sm:$0xff] }
 0x295   : > { %vm1299_vm1 = vcmp.gt.f32.partialorder %v1283_v13, 0.0 }
 0x296   : > { %2289 = vmatpush.msrb.mxu2 %v1875_v23  ;;  %1950 = vmatpush.msra.mxu3 %v1949_v37  ;;  %v1286_v23 = vld [vmem:[#allocation4 + $0x40] sm:$0xff] }
 0x297   : > { %vm1302_vm2 = vcmp.gt.f32.partialorder %v1286_v23, 0.0 }
 0x298   : > { %2404 = vmatpush.msrb.mxu3 %v3576_v11  ;;  %2293 = vmatpush.msrb.mxu2 %v1881_v51 }
 0x29a   : > { %2406 = vmatpush.msrb.mxu3 %v3557_v0  ;;  %2297 = vmatpush.msrb.mxu2 %v1887_v3  ;;  %v1141_v0 = vpop.permute.xlu2 %1140 }
 0x29c   : > { %2408 = vmatpush.msrb.mxu3 %v3560_v57  ;;  %2301 = vmatpush.msrb.mxu2 %v1893_v34 }
 0x29e   : > { %2410 = vmatpush.msrb.mxu3 %v3565_v59  ;;  %2305 = vmatpush.msrb.mxu2 %v1899_v48 }
 0x2a0   : > { %2412 = vmatpush.msrb.mxu3 %v3573_v10  ;;  %2309 = vmatpush.msrb.mxu2 %v1905_v61 }
 0x2a2   : > { %2414 = vmatpush.msrb.mxu3 %v3583_v21  ;;  %2313 = vmatpush.msrb.mxu2 %v1911_v63  ;;  %v1146_v57 = vpop.permute.xlu2 %1145 }
 0x2a4   : > { %2416 = vmatpush.msrb.mxu3 %v3597_v9  ;;  %2317 = vmatpush.msrb.mxu2 %v1917_v36  ;;  %v1282_v36 = vld [vmem:[#allocation4 + $0x20] sm:$0xff] }
 0x2a5   : > { %vm1298_vm10 = vcmp.gt.f32.partialorder %v1282_v36, 0.0 }
 0x2a6   : > { %2418 = vmatpush.msrb.mxu3 %v3607_v22  ;;  %2321 = vmatpush.msrb.mxu2 %v1923_v43  ;;  %v1280_v43 = vld [vmem:[#allocation4 + $0x10] sm:$0xff] }
 0x2a7   : > { %vm1296_vm11 = vcmp.gt.f32.partialorder %v1280_v43, 0.0 }
 0x2a8   : > { %2420 = vmatpush.msrb.mxu3 %v3625_v42  ;;  %2325 = vmatpush.msrb.mxu2 %v1929_v52  ;;  %v1279_v42 = vld [vmem:[#allocation4 + $0x8] sm:$0xff] }
 0x2a9   : > { %v1176_v51 = vpop.permute.xlu1 %1175  ;;  %vm1295_vm3 = vcmp.gt.f32.partialorder %v1279_v42, 0.0 }
 0x2aa   : > { %2422 = vmatpush.msrb.mxu3 %v3639_v26  ;;  %2329 = vmatpush.msrb.mxu2 %v1935_v31  ;;  %v1151_v10 = vpop.permute.xlu2 %1150 }
 0x2ac   : > { %2424 = vmatpush.msrb.mxu3 %v3653_v18  ;;  %2333 = vmatpush.msrb.mxu2 %v1941_v56  ;;  %v1278_v18 = vld [vmem:[#allocation4] sm:$0xff] }
 0x2ad   : > { %vm1294_vm7 = vcmp.gt.f32.partialorder %v1278_v18, 0.0 }
 0x2ae   : > { %2426 = vmatpush.msrb.mxu3 %v3667_v44  ;;  %2337 = vmatpush.msrb.mxu2 %v1947_v62 }
 0x2b0   : > { %2428 = vmatpush.msrb.mxu3 %v3681_v49 }
 0x2b1   : > { %v1036_v59 = vpop.f32.mrf.mxu3 }
 0x2b2   : > { %2430 = vmatpush.msrb.mxu3 %v3695_v14  ;;  %v1156_v35 = vpop.permute.xlu2 %1155 }
 0x2b4   : > { %2432 = vmatpush.msrb.mxu3 %v3709_v5 }
 0x2b6   : > { %2434 = vmatpush.msrb.mxu3 %v3723_v41 }
 0x2b9   : > { %v1010_v4 = vpop.f32.mrf.mxu2  ;;  %v1084_v11 = vpop.f32.mrf.mxu3 }
 0x2ba   : > { %v1037_v21 = vadd.f32 %v1036_v59, %v1010_v4  ;;  %v1161_v16 = vpop.permute.xlu2 %1160 }
 0x2c1   : > { %v1060_v15 = vpop.f32.mrf.mxu2  ;;  %v1130_v19 = vpop.f32.mrf.mxu3 }
 0x2c2   : > { %v1061_v30 = vadd.f32 %v1060_v15, %v1037_v21  ;;  %v1166_v24 = vpop.permute.xlu2 %1165 }
 0x2c4   : > { %v1085_v9 = vadd.f32 %v1084_v11, %v1061_v30 }
 0x2c9   : > { %v1108_v8 = vpop.f32.mrf.mxu2 }
 0x2ca   : > { %v1109_v17 = vadd.f32 %v1108_v8, %v1085_v9  ;;  %v1171_v37 = vpop.permute.xlu2 %1170 }
 0x2cc   : > { %v1131_v22 = vadd.f32 %v1130_v19, %v1109_v17  ;;  %v1191_v17 = vpop.permute.xlu1 %1190 }
 0x2ce   : > { %v3809_v27 = vperm.slane %v1131_v22, 0 }
 0x2d0   : > { %v1222_v26 = vadd.f32 %v3809_v27, %v1176_v51  ;;  %v1215_v33 = vadd.f32 %v3809_v27, %v1141_v0  ;;  %v1214_v3 = vadd.f32 %v3809_v27, %v1136_v47  ;;  %v1218_v2 = vadd.f32 %v3809_v27, %v1156_v35  ;;  %v1287_v47 = vld [vmem:[#allocation4 + $0x48] sm:$0xff] }
 0x2d1   : > { %v1216_v48 = vadd.f32 %v3809_v27, %v1146_v57  ;;  %v1220_v52 = vadd.f32 %v3809_v27, %v1166_v24  ;;  %v1217_v46 = vadd.f32 %v3809_v27, %v1151_v10  ;;  %v1219_v6 = vadd.f32 %v3809_v27, %v1161_v16  ;;  %v1285_v10 = vld [vmem:[#allocation4 + $0x38] sm:$0xff]  ;;  %v1291_v24 = vld [vmem:[#allocation4 + $0x68] sm:$0xff] }
 0x2d2   : > { %vm1238_vm4 = vcmp.gt.f32.partialorder %v1222_v26, 0.0  ;;  %v1254_v34 = vmul.f32 0.2, %v1222_v26  ;;  %vm1231_vm5 = vcmp.gt.f32.partialorder %v1215_v33, 0.0  ;;  %v1247_v44 = vmul.f32 0.2, %v1215_v33  ;;  %v1181_v11 = vpop.permute.xlu2 %1180 }
 0x2d3   : > { %vm1230_vm6 = vcmp.gt.f32.partialorder %v1214_v3, 0.0  ;;  %v1246_v29 = vmul.f32 0.2, %v1214_v3  ;;  %v1250_v5 = vmul.f32 0.2, %v1218_v2  ;;  %vm1234_vm8 = vcmp.gt.f32.partialorder %v1218_v2, 0.0 }
 0x2d4   : > { %v1270_v49 = vsel %vm1238_vm4, %v1222_v26, %v1254_v34  ;;  %v1263_v12 = vsel %vm1231_vm5, %v1215_v33, %v1247_v44  ;;  %v1248_v41 = vmul.f32 0.2, %v1216_v48  ;;  %vm1232_vm9 = vcmp.gt.f32.partialorder %v1216_v48, 0.0 }
 0x2d5   : > { %v3816_v61 = vsel %vm1302_vm2, %v1270_v49, %v1286_v23  ;;  %v3818_v14 = vsel %vm1295_vm3, %v1263_v12, %v1279_v42  ;;  %v1262_v28 = vsel %vm1230_vm6, %v1214_v3, %v1246_v29  ;;  %v1266_v45 = vsel %vm1234_vm8, %v1218_v2, %v1250_v5 }
 0x2d6   : > { %1342 = vmax.xlane.f32.xlu0 %v3816_v61  ;;  %1328 = vmax.xlane.f32.xlu1 %v3818_v14  ;;  %v3822_v63 = vsel %vm1294_vm7, %v1262_v28, %v1278_v18  ;;  %v1264_v58 = vsel %vm1232_vm9, %v1216_v48, %v1248_v41  ;;  %v3827_v25 = vsel %vm1298_vm10, %v1266_v45, %v1282_v36  ;;  %v1252_v60 = vmul.f32 0.2, %v1220_v52  ;;  %v1289_v48 = vld [vmem:[#allocation4 + $0x58] sm:$0xff] }
 0x2d7   : > { %1326 = vmax.xlane.f32.xlu2 %v3822_v63  ;;  %v1312_v31 = vsel %vm1296_vm11, %v1264_v58, %v1280_v43  ;;  %vm1236_vm12 = vcmp.gt.f32.partialorder %v1220_v52, 0.0  ;;  %v1249_v56 = vmul.f32 0.2, %v1217_v46  ;;  %vm1233_vm13 = vcmp.gt.f32.partialorder %v1217_v46, 0.0 }
 0x2d8   : > { %v1268_v32 = vsel %vm1236_vm12, %v1220_v52, %v1252_v60  ;;  %v1251_v40 = vmul.f32 0.2, %v1219_v6  ;;  %vm1235_vm0 = vcmp.gt.f32.partialorder %v1219_v6, 0.0  ;;  %v1221_v57 = vadd.f32 %v3809_v27, %v1171_v37 }
 0x2d9   : > { %v1265_v62 = vsel %vm1233_vm13, %v1217_v46, %v1249_v56  ;;  %v3831_v1 = vsel %vm1300_vm14, %v1268_v32, %v1284_v54  ;;  %vm1301_vm3 = vcmp.gt.f32.partialorder %v1285_v10, 0.0  ;;  %v1223_v21 = vadd.f32 %v3809_v27, %v1181_v11  ;;  %v1290_v32 = vld [vmem:[#allocation4 + $0x60] sm:$0xff] }
 0x2da   : > { %v1313_v20 = vsel %vm1297_vm15, %v1265_v62, %v1281_v7  ;;  %v1267_v0 = vsel %vm1235_vm0, %v1219_v6, %v1251_v40  ;;  %v1253_v4 = vmul.f32 0.2, %v1221_v57  ;;  %vm1237_vm2 = vcmp.gt.f32.partialorder %v1221_v57, 0.0 }
 0x2db   : > { %v3835_v59 = vsel %vm1299_vm1, %v1267_v0, %v1283_v13  ;;  %v1255_v35 = vmul.f32 0.2, %v1223_v21  ;;  %vm1239_vm4 = vcmp.gt.f32.partialorder %v1223_v21, 0.0  ;;  %vm1303_vm5 = vcmp.gt.f32.partialorder %v1287_v47, 0.0 }
 0x2dc   : > { %v1269_v15 = vsel %vm1237_vm2, %v1221_v57, %v1253_v4  ;;  %vm1305_vm7 = vcmp.gt.f32.partialorder %v1289_v48, 0.0  ;;  %vm1307_vm9 = vcmp.gt.f32.partialorder %v1291_v24, 0.0  ;;  %vm1306_vm11 = vcmp.gt.f32.partialorder %v1290_v32, 0.0 }
 0x2dd   : > { %v3839_v30 = vsel %vm1301_vm3, %v1269_v15, %v1285_v10  ;;  %v1271_v9 = vsel %vm1239_vm4, %v1223_v21, %v1255_v35  ;;  %v1288_v15 = vld [vmem:[#allocation4 + $0x50] sm:$0xff] }
 0x2de   : > { %1334 = vmax.xlane.f32.xlu1 %v3827_v25  ;;  %v3842_v8 = vsel %vm1303_vm5, %v1271_v9, %v1287_v47  ;;  %vm1304_vm13 = vcmp.gt.f32.partialorder %v1288_v15, 0.0 }
 0x2df   : > { %1330 = vmax.xlane.f32.xlu2 %v1312_v31 }
 0x2e6   : > { %1338 = vmax.xlane.f32.xlu1 %v3831_v1 }
 0x2e7   : > { %1332 = vmax.xlane.f32.xlu2 %v1313_v20 }
 0x2ef   : > { %1336 = vmax.xlane.f32.xlu2 %v3835_v59 }
 0x2f7   : > { %1340 = vmax.xlane.f32.xlu2 %v3839_v30 }
 0x2ff   : > { %1344 = vmax.xlane.f32.xlu2 %v3842_v8  ;;  %1200 = vperm.xlu1 %2862, %v3552_v39  }
 0x317   : > { %1185 = vperm.xlu2 %2863, %v3562_v38   ;;  %v1225_v38 = vadd.f32 %v3809_v27, %v1191_v17 }
 0x319   : > { %v1257_v44 = vmul.f32 0.2, %v1225_v38  ;;  %vm1241_vm6 = vcmp.gt.f32.partialorder %v1225_v38, 0.0 }
 0x31b   : > { %v1273_v12 = vsel %vm1241_vm6, %v1225_v38, %v1257_v44 }
 0x31c   : > { %v3863_v28 = vsel %vm1305_vm7, %v1273_v12, %v1289_v48 }
 0x31f   : > { %1195 = vperm.xlu2 %2863, %v3554_v50  }
 0x327   : > { %1210 = vperm.xlu2 %2863, %v3567_v53  }
 0x349   : > { %v1329_v23 = vpop.xlane.xlu1 %1328  ;;  %v1343_v36 = vpop.xlane.xlu0 %1342 }
 0x34a   : > { %v1327_v19 = vpop.xlane.xlu2 %1326  ;;  %v1359_v16 = vsub.f32 %v3818_v14, %v1329_v23  ;;  %v1366_v41 = vsub.f32 %v3816_v61, %v1343_v36 }
 0x34b   : > { %v1358_v22 = vsub.f32 %v3822_v63, %v1327_v19 }
 0x34c   : > { %v1376_v33 = vmul.f32 1.442695, %v1359_v16  ;;  %v1390_v46 = vmul.f32 1.442695, %v1366_v41 }
 0x34d   : > { %v1374_v42 = vmul.f32 1.442695, %v1358_v22  ;;  %v1293_v22 = vld [vmem:[#allocation4 + $0x78] sm:$0xff] }
 0x34e   : > { %vm1309_vm15 = vcmp.gt.f32.partialorder %v1293_v22, 0.0 }
 0x34f   : > { %2865 = vpow2.f32 %v1374_v42 }
 0x351   : > { %v1335_v29 = vpop.xlane.xlu1 %1334 }
 0x352   : > { %v1331_v51 = vpop.xlane.xlu2 %1330  ;;  %v1362_v56 = vsub.f32 %v3827_v25, %v1335_v29 }
 0x353   : > { %v1360_v26 = vsub.f32 %v1312_v31, %v1331_v51 }
 0x354   : > { %v1382_v6 = vmul.f32 1.442695, %v1362_v56 }
 0x355   : > { %v1378_v3 = vmul.f32 1.442695, %v1360_v26  ;;  %v3851_v39 = vpop.eup %2865 }
 0x356   : > { %1406 = vadd.xlane.f32.xlu0 %v3851_v39 }
 0x357   : > { %2867 = vpow2.f32 %v1378_v3 }
 0x358   : > { %2869 = vpow2.f32 %v1376_v33 }
 0x359   : > { %v1339_v63 = vpop.xlane.xlu1 %1338 }
 0x35a   : > { %v1333_v50 = vpop.xlane.xlu2 %1332  ;;  %v1364_v57 = vsub.f32 %v3831_v1, %v1339_v63 }
 0x35b   : > { %v1361_v53 = vsub.f32 %v1313_v20, %v1333_v50 }
 0x35c   : > { %v1386_v10 = vmul.f32 1.442695, %v1364_v57 }
 0x35d   : > { %v3855_v18 = vpop.eup %2867  ;;  %v1380_v2 = vmul.f32 1.442695, %v1361_v53 }
 0x35e   : > { %v3857_v34 = vpop.eup %2869  ;;  %1410 = vadd.xlane.f32.xlu1 %v3855_v18 }
 0x35f   : > { %2871 = vpow2.f32 %v1380_v2  ;;  %1408 = vadd.xlane.f32.xlu0 %v3857_v34 }
 0x360   : > { %2873 = vpow2.f32 %v1390_v46 }
 0x361   : > { %2875 = vpow2.f32 %v1382_v6 }
 0x362   : > { %v1337_v49 = vpop.xlane.xlu2 %1336 }
 0x363   : > { %v1363_v13 = vsub.f32 %v3835_v59, %v1337_v49 }
 0x365   : > { %v3861_v14 = vpop.eup %2871  ;;  %v1384_v37 = vmul.f32 1.442695, %v1363_v13 }
 0x366   : > { %1348 = vmax.xlane.f32.xlu1 %v3863_v28  ;;  %1412 = vadd.xlane.f32.xlu2 %v3861_v14  ;;  %v3875_v61 = vpop.eup %2873 }
 0x367   : > { %v3884_v0 = vpop.eup %2875  ;;  %2877 = vpow2.f32 %v1384_v37 }
 0x368   : > { %2879 = vpow2.f32 %v1386_v10 }
 0x36a   : > { %v1341_v5 = vpop.xlane.xlu2 %1340 }
 0x36b   : > { %v1365_v11 = vsub.f32 %v3839_v30, %v1341_v5 }
 0x36d   : > { %v3890_v21 = vpop.eup %2877  ;;  %v1388_v35 = vmul.f32 1.442695, %v1365_v11 }
 0x36e   : > { %v3896_v9 = vpop.eup %2879 }
 0x36f   : > { %2881 = vpow2.f32 %v1388_v35 }
 0x371   : > { %v1201_v43 = vpop.permute.xlu1 %1200 }
 0x372   : > { %v1227_v45 = vadd.f32 %v3809_v27, %v1201_v43  ;;  %v3869_v52 = vpop.xlane.xlu2 %1344 }
 0x373   : > { %1205 = vperm.xlu0 %2864, %v3550_v55  }
 0x374   : > { %v1259_v58 = vmul.f32 0.2, %v1227_v45  ;;  %vm1243_vm8 = vcmp.gt.f32.partialorder %v1227_v45, 0.0 }
 0x375   : > { %v3900_v17 = vpop.eup %2881 }
 0x376   : > { %v1275_v31 = vsel %vm1243_vm8, %v1227_v45, %v1259_v58 }
 0x377   : > { %v3872_v60 = vsel %vm1307_vm9, %v1275_v31, %v1291_v24 }
 0x378   : > { %1352 = vmax.xlane.f32.xlu2 %v3872_v60 }
 0x37a   : > { %v1186_v54 = vpop.permute.xlu2 %1185 }
 0x37b   : > { %v1224_v25 = vadd.f32 %v3809_v27, %v1186_v54 }
 0x37d   : > { %v1256_v4 = vmul.f32 0.2, %v1224_v25  ;;  %vm1240_vm12 = vcmp.gt.f32.partialorder %v1224_v25, 0.0 }
 0x37f   : > { %v1272_v59 = vsel %vm1240_vm12, %v1224_v25, %v1256_v4 }
 0x380   : > { %1422 = vadd.xlane.f32.xlu2 %v3875_v61  ;;  %v3893_v47 = vsel %vm1304_vm13, %v1272_v59, %v1288_v15 }
 0x382   : > { %v1196_v7 = vpop.permute.xlu2 %1195 }
 0x383   : > { %v1226_v55 = vadd.f32 %v3809_v27, %v1196_v7 }
 0x385   : > { %v1258_v62 = vmul.f32 0.2, %v1226_v55  ;;  %vm1242_vm10 = vcmp.gt.f32.partialorder %v1226_v55, 0.0 }
 0x387   : > { %v1274_v20 = vsel %vm1242_vm10, %v1226_v55, %v1258_v62 }
 0x388   : > { %v3880_v40 = vsel %vm1306_vm11, %v1274_v20, %v1290_v32 }
 0x389   : > { %1350 = vmax.xlane.f32.xlu1 %v3880_v40 }
 0x38a   : > { %v1211_v1 = vpop.permute.xlu2 %1210 }
 0x38b   : > { %v1229_v30 = vadd.f32 %v3809_v27, %v1211_v1 }
 0x38d   : > { %v1261_v19 = vmul.f32 0.2, %v1229_v30  ;;  %vm1245_vm14 = vcmp.gt.f32.partialorder %v1229_v30, 0.0 }
 0x38f   : > { %v1277_v23 = vsel %vm1245_vm14, %v1229_v30, %v1261_v19 }
 0x390   : > { %v3903_v42 = vsel %vm1309_vm15, %v1277_v23, %v1293_v22  ;;  %v1292_v23 = vld [vmem:[#allocation4 + $0x70] sm:$0xff] }
 0x391   : > { %1414 = vadd.xlane.f32.xlu1 %v3884_v0  ;;  %vm1308_vm14 = vcmp.gt.f32.partialorder %v1292_v23, 0.0 }
 0x399   : > { %1416 = vadd.xlane.f32.xlu1 %v3890_v21 }
 0x39d   : > { %1346 = vmax.xlane.f32.xlu0 %v3893_v47 }
 0x3a1   : > { %1418 = vadd.xlane.f32.xlu1 %v3896_v9 }
 0x3a5   : > { %1420 = vadd.xlane.f32.xlu0 %v3900_v17 }
 0x3ad   : > { %1356 = vmax.xlane.f32.xlu0 %v3903_v42 }
 0x3c9   : > { %v1407_v16 = vpop.xlane.xlu0 %1406 }
 0x3ca   : > { %2883 = vrcp.f32 %v1407_v16  ;;  %v1449_v53 = vand.u32 2147483648, %v1407_v16  ;;  %v1447_v2 = vand.u32 2147483647, %v1407_v16  ;;  %vm1443_vm1 = vweird.f32 %v1407_v16 }
 0x3cc   : > { %v1450_v41 = vor.u32 1.1754944e-38, %v1449_v53  ;;  %vm1448_vm3 = vcmp.eq.f32.partialorder %v1447_v2, 8.507059e+37 }
 0x3d0   : > { %v2884_v51 = vpop.eup %2883 }
 0x3d1   : > { %v1411_v26 = vpop.xlane.xlu1 %1410  ;;  %v1439_v33 = vmul.f32 %v2884_v51, %v1407_v16  ;;  %vm1444_vm0 = vweird.f32 %v2884_v51  ;;  %v1367_v16 = vsub.f32 %v3842_v8, %v3869_v52 }
 0x3d2   : > { %v1409_v3 = vpop.xlane.xlu0 %1408  ;;  %2885 = vrcp.f32 %v1411_v26  ;;  %vm3906_vm2 = vmor %vm1443_vm1, %vm1444_vm0  ;;  %v1479_v31 = vand.u32 2147483648, %v1411_v26  ;;  %v1477_v32 = vand.u32 2147483647, %v1411_v26  ;;  %vm1473_vm6 = vweird.f32 %v1411_v26 }
 0x3d3   : > { %2887 = vrcp.f32 %v1409_v3  ;;  %v1440_v50 = vsub.f32 1.0, %v1439_v33  ;;  %v1464_v45 = vand.u32 2147483648, %v1409_v3  ;;  %v1462_v6 = vand.u32 2147483647, %v1409_v3 }
 0x3d4   : > { %vm1458_vm7 = vweird.f32 %v1409_v3  ;;  %v1480_v37 = vor.u32 1.1754944e-38, %v1479_v31  ;;  %vm1478_vm10 = vcmp.eq.f32.partialorder %v1477_v32, 8.507059e+37 }
 0x3d5   : > { %v1441_v38 = vmul.f32 %v2884_v51, %v1440_v50  ;;  %v1465_v57 = vor.u32 1.1754944e-38, %v1464_v45  ;;  %vm1463_vm11 = vcmp.eq.f32.partialorder %v1462_v6, 8.507059e+37 }
 0x3d7   : > { %v1442_v29 = vadd.f32 %v2884_v51, %v1441_v38 }
 0x3d8   : > { %v2886_v44 = vpop.eup %2885 }
 0x3d9   : > { %v2888_v48 = vpop.eup %2887  ;;  %v1469_v12 = vmul.f32 %v2886_v44, %v1411_v26  ;;  %v1349_v63 = vpop.xlane.xlu1 %1348  ;;  %v1446_v36 = vsel %vm3906_vm2, %v2884_v51, %v1442_v29  ;;  %vm1474_vm4 = vweird.f32 %v2886_v44 }
 0x3da   : > { %v3910_v5 = vpop.xlane.xlu2 %1412  ;;  %v1454_v43 = vmul.f32 %v2888_v48, %v1409_v3  ;;  %v1369_v24 = vsub.f32 %v3863_v28, %v1349_v63  ;;  %v1451_v56 = vsel %vm1448_vm3, %v1450_v41, %v1446_v36  ;;  %vm1459_vm5 = vweird.f32 %v2888_v48  ;;  %vm1475_vm8 = vmor %vm1473_vm6, %vm1474_vm4 }
 0x3db   : > { %v1470_v58 = vsub.f32 1.0, %v1469_v12  ;;  %2889 = vrcp.f32 %v3910_v5  ;;  %v1678_v55 = vmul.f32 %v3851_v39, %v1451_v56  ;;  %vm1460_vm9 = vmor %vm1458_vm7, %vm1459_vm5  ;;  %v1492_v51 = vand.u32 2147483647, %v3910_v5 }
 0x3dc   : > { %v1455_v46 = vsub.f32 1.0, %v1454_v43  ;;  %v1396_v54 = vmul.f32 1.442695, %v1369_v24  ;;  %v1494_v26 = vand.u32 2147483648, %v3910_v5  ;;  %vm1488_vm13 = vweird.f32 %v3910_v5 }
 0x3dd   : > { %v1471_v7 = vmul.f32 %v2886_v44, %v1470_v58  ;;  %v3917_v28 = vand.u32 4294901760, %v1678_v55  ;;  %vm1493_vm1 = vcmp.eq.f32.partialorder %v1492_v51, 8.507059e+37 }
 0x3de   : > { %v1456_v62 = vmul.f32 %v2888_v48, %v1455_v46  ;;  %2891 = vpow2.f32 %v1396_v54  ;;  %v1495_v29 = vor.u32 1.1754944e-38, %v1494_v26 }
 0x3df   : > { %v1472_v20 = vadd.f32 %v2886_v44, %v1471_v7  ;;  %v1727_v10 = vsub.f32 %v1678_v55, %v3917_v28  ;;  %1952 = vmatmul.f32.vlgmr.msra.gmra.mxu3 %v3917_v28 }
 0x3e0   : > { %v1457_v13 = vadd.f32 %v2888_v48, %v1456_v62 }
 0x3e1   : > { %v2890_v25 = vpop.eup %2889  ;;  %v1476_v4 = vsel %vm1475_vm8, %v2886_v44, %v1472_v20  ;;  %2066 = vmatmul.f32.vlgmr.msrb.gmra.mxu0 %v1727_v10  ;;  %v1728_v59 = vand.u32 4294901760, %v1727_v10  ;;  %v1392_v44 = vmul.f32 1.442695, %v1367_v16 }
 0x3e2   : > { %v1461_v39 = vsel %vm1460_vm9, %v2888_v48, %v1457_v13  ;;  %v1484_v11 = vmul.f32 %v2890_v25, %v3910_v5  ;;  %v1481_v15 = vsel %vm1478_vm10, %v1480_v37, %v1476_v4  ;;  %vm1489_vm12 = vweird.f32 %v2890_v25 }
 0x3e3   : > { %v1466_v35 = vsel %vm1463_vm11, %v1465_v57, %v1461_v39  ;;  %v1680_v1 = vmul.f32 %v3855_v18, %v1481_v15  ;;  %2180 = vmatmul.f32.vlgmr.msrb.gmra.mxu1 %v1728_v59  ;;  %v1729_v3 = vsub.f32 %v1727_v10, %v1728_v59  ;;  %vm1490_vm0 = vmor %vm1488_vm13, %vm1489_vm12  ;;  %2893 = vpow2.f32 %v1392_v44 }
 0x3e4   : > { %v3923_v30 = vpop.eup %2891  ;;  %v1485_v19 = vsub.f32 1.0, %v1484_v11  ;;  %v1679_v22 = vmul.f32 %v3857_v34, %v1466_v35 }
 0x3e5   : > { %v1206_v33 = vpop.permute.xlu0 %1205  ;;  %1428 = vadd.xlane.f32.xlu0 %v3923_v30  ;;  %v1730_v34 = vand.u32 4294901760, %v1729_v3  ;;  %v3935_v8 = vand.u32 4294901760, %v1680_v1 }
 0x3e6   : > { %v1486_v50 = vmul.f32 %v2890_v25, %v1485_v19  ;;  %v1228_v18 = vadd.f32 %v3809_v27, %v1206_v33  ;;  %v3932_v38 = vand.u32 4294901760, %v1679_v22 }
 0x3e7   : > { %1731 = vmatmul.f32.vlgmr.msra.gmra.mxu2 %v1730_v34  ;;  %v1743_v63 = vsub.f32 %v1680_v1, %v3935_v8 }
 0x3e8   : > { %v1487_v52 = vadd.f32 %v2890_v25, %v1486_v50  ;;  %v1260_v53 = vmul.f32 0.2, %v1228_v18  ;;  %v1735_v2 = vsub.f32 %v1679_v22, %v3932_v38  ;;  %vm1244_vm15 = vcmp.gt.f32.partialorder %v1228_v18, 0.0  ;;  %1956 = vmatmul.f32.gmra.mxu3 %v3932_v38 }
 0x3e9   : > { %v1744_v24 = vand.u32 4294901760, %v1743_v63  ;;  %v3948_v58 = vpop.eup %2893 }
 0x3ea   : > { %v1491_v27 = vsel %vm1490_vm0, %v2890_v25, %v1487_v52  ;;  %v1736_v48 = vand.u32 4294901760, %v1735_v2  ;;  %v1276_v49 = vsel %vm1244_vm15, %v1228_v18, %v1260_v53  ;;  %2071 = vmatmul.f32.gmra.mxu0 %v1735_v2 }
 0x3eb   : > { %v3940_v12 = vsel %vm1308_vm14, %v1276_v49, %v1292_v23  ;;  %v1496_v5 = vsel %vm1493_vm1, %v1495_v29, %v1491_v27  ;;  %v1745_v46 = vsub.f32 %v1743_v63, %v1744_v24  ;;  %v1353_v55 = vpop.xlane.xlu2 %1352 }
 0x3ec   : > { %1354 = vmax.xlane.f32.xlu1 %v3940_v12  ;;  %v1737_v36 = vsub.f32 %v1735_v2, %v1736_v48  ;;  %v1681_v41 = vmul.f32 %v3861_v14, %v1496_v5  ;;  %2186 = vmatmul.f32.gmra.mxu1 %v1736_v48  ;;  %v1371_v3 = vsub.f32 %v3872_v60, %v1353_v55 }
 0x3ed   : > { %v1746_v54 = vand.u32 4294901760, %v1745_v46 }
 0x3ee   : > { %v1738_v43 = vand.u32 4294901760, %v1737_v36  ;;  %v3945_v45 = vand.u32 4294901760, %v1681_v41  ;;  %v1400_v29 = vmul.f32 1.442695, %v1371_v3 }
 0x3f0   : > { %1739 = vmatmul.f32.gmra.mxu2 %v1738_v43  ;;  %1960 = vmatmul.f32.gmra.mxu3 %v3935_v8  ;;  %v1751_v31 = vsub.f32 %v1681_v41, %v3945_v45 }
 0x3f2   : > { %2076 = vmatmul.f32.gmra.mxu0 %v1743_v63  ;;  %v1752_v14 = vand.u32 4294901760, %v1751_v31 }
 0x3f3   : > { %v3956_v37 = vpop.xlane.xlu2 %1422 }
 0x3f4   : > { %1424 = vadd.xlane.f32.xlu1 %v3948_v58  ;;  %2192 = vmatmul.f32.gmra.mxu1 %v1744_v24  ;;  %v1753_v56 = vsub.f32 %v1751_v31, %v1752_v14  ;;  %vm1563_vm10 = vweird.f32 %v3956_v37 }
 0x3f6   : > { %v1754_v6 = vand.u32 4294901760, %v1753_v56 }
 0x3f8   : > { %1747 = vmatmul.f32.gmra.mxu2 %v1746_v54  ;;  %1964 = vmatmul.f32.gmra.mxu3 %v3945_v45  ;;  %v1567_v54 = vand.u32 2147483647, %v3956_v37 }
 0x3fa   : > { %2081 = vmatmul.f32.gmra.mxu0 %v1751_v31 }
 0x3fc   : > { %v1351_v7 = vpop.xlane.xlu1 %1350  ;;  %2198 = vmatmul.f32.gmra.mxu1 %v1752_v14 }
 0x3fd   : > { %v1370_v32 = vsub.f32 %v3880_v40, %v1351_v7 }
 0x3ff   : > { %v1398_v62 = vmul.f32 1.442695, %v1370_v32 }
 0x400   : > { %1755 = vmatmul.f32.gmra.mxu2 %v1754_v6 }
 0x401   : > { %2895 = vpow2.f32 %v1398_v62 }
 0x404   : > { %v1415_v20 = vpop.xlane.xlu1 %1414 }
 0x405   : > { %2897 = vrcp.f32 %v1415_v20  ;;  %v1509_v39 = vand.u32 2147483648, %v1415_v20  ;;  %v1507_v59 = vand.u32 2147483647, %v1415_v20  ;;  %vm1503_vm3 = vweird.f32 %v1415_v20 }
 0x406   : > { %2899 = vrcp.f32 %v3956_v37 }
 0x407   : > { %v3954_v13 = vpop.eup %2895  ;;  %v1510_v51 = vor.u32 1.1754944e-38, %v1509_v39  ;;  %vm1508_vm5 = vcmp.eq.f32.partialorder %v1507_v59, 8.507059e+37 }
 0x408   : > { %1430 = vadd.xlane.f32.xlu1 %v3954_v13 }
 0x40b   : > { %v2898_v25 = vpop.eup %2897 }
 0x40c   : > { %v1499_v57 = vmul.f32 %v2898_v25, %v1415_v20  ;;  %v1417_v4 = vpop.xlane.xlu1 %1416  ;;  %vm1504_vm2 = vweird.f32 %v2898_v25  ;;  %v3960_v15 = vpop.eup %2899 }
 0x40d   : > { %2901 = vrcp.f32 %v1417_v4  ;;  %vm1505_vm4 = vmor %vm1503_vm3, %vm1504_vm2  ;;  %v1559_v23 = vmul.f32 %v3960_v15, %v3956_v37  ;;  %v1524_v18 = vand.u32 2147483648, %v1417_v4  ;;  %v1522_v2 = vand.u32 2147483647, %v1417_v4 }
 0x40e   : > { %v1500_v40 = vsub.f32 1.0, %v1499_v57  ;;  %vm1518_vm7 = vweird.f32 %v1417_v4  ;;  %vm1564_vm11 = vweird.f32 %v3960_v15 }
 0x40f   : > { %v1560_v52 = vsub.f32 1.0, %v1559_v23  ;;  %v1525_v49 = vor.u32 1.1754944e-38, %v1524_v18  ;;  %vm1523_vm9 = vcmp.eq.f32.partialorder %v1522_v2, 8.507059e+37  ;;  %v1569_v23 = vand.u32 2147483648, %v3956_v37  ;;  %vm4012_vm1 = vmor %vm1563_vm10, %vm1564_vm11 }
 0x410   : > { %v1501_v10 = vmul.f32 %v2898_v25, %v1500_v40  ;;  %v1347_v11 = vpop.xlane.xlu0 %1346 }
 0x411   : > { %v1368_v35 = vsub.f32 %v3893_v47, %v1347_v11 }
 0x412   : > { %v1502_v1 = vadd.f32 %v2898_v25, %v1501_v10 }
 0x413   : > { %v2902_v19 = vpop.eup %2901  ;;  %v1394_v22 = vmul.f32 1.442695, %v1368_v35 }
 0x414   : > { %v1506_v16 = vsel %vm1505_vm4, %v2898_v25, %v1502_v1  ;;  %v1514_v26 = vmul.f32 %v2902_v19, %v1417_v4  ;;  %v3965_v33 = vpop.xlane.xlu1 %1418  ;;  %vm1519_vm6 = vweird.f32 %v2902_v19 }
 0x415   : > { %2903 = vpow2.f32 %v1394_v22  ;;  %v1511_v47 = vsel %vm1508_vm5, %v1510_v51, %v1506_v16  ;;  %vm1520_vm8 = vmor %vm1518_vm7, %vm1519_vm6  ;;  %v1539_v56 = vand.u32 2147483648, %v3965_v33  ;;  %vm1533_vm13 = vweird.f32 %v3965_v33 }
 0x416   : > { %v1515_v50 = vsub.f32 1.0, %v1514_v26  ;;  %2905 = vrcp.f32 %v3965_v33  ;;  %v1682_v34 = vmul.f32 %v3884_v0, %v1511_v47  ;;  %v1561_v0 = vmul.f32 %v3960_v15, %v1560_v52 }
 0x417   : > { %v1540_v39 = vor.u32 1.1754944e-38, %v1539_v56  ;;  %v1570_v52 = vor.u32 1.1754944e-38, %v1569_v23  ;;  %vm1568_vm5 = vcmp.eq.f32.partialorder %v1567_v54, 8.507059e+37 }
 0x418   : > { %v1516_v53 = vmul.f32 %v2902_v19, %v1515_v50  ;;  %v3970_v44 = vpop.xlane.xlu0 %1420  ;;  %v3973_v48 = vand.u32 4294901760, %v1682_v34  ;;  %v1562_v7 = vadd.f32 %v3960_v15, %v1561_v0 }
 0x419   : > { %2907 = vrcp.f32 %v3970_v44  ;;  %v1554_v11 = vand.u32 2147483648, %v3970_v44  ;;  %vm1548_vm2 = vweird.f32 %v3970_v44 }
 0x41a   : > { %v1517_v27 = vadd.f32 %v2902_v19, %v1516_v53  ;;  %1968 = vmatmul.f32.gmra.mxu3 %v3973_v48  ;;  %v1759_v36 = vsub.f32 %v1682_v34, %v3973_v48  ;;  %2909 = vpow2.f32 %v1400_v29  ;;  %v1566_v18 = vsel %vm4012_vm1, %v3960_v15, %v1562_v7 }
 0x41b   : > { %v3975_v60 = vpop.eup %2903  ;;  %v1555_v50 = vor.u32 1.1754944e-38, %v1554_v11 }
 0x41c   : > { %v2906_v63 = vpop.eup %2905  ;;  %v1521_v5 = vsel %vm1520_vm8, %v2902_v19, %v1517_v27  ;;  %1426 = vadd.xlane.f32.xlu2 %v3975_v60  ;;  %2086 = vmatmul.f32.gmra.mxu0 %v1759_v36  ;;  %v1760_v24 = vand.u32 4294901760, %v1759_v36 }
 0x41d   : > { %v1529_v41 = vmul.f32 %v2906_v63, %v3965_v33  ;;  %v1526_v43 = vsel %vm1523_vm9, %v1525_v49, %v1521_v5  ;;  %vm1534_vm12 = vweird.f32 %v2906_v63 }
 0x41e   : > { %v1683_v46 = vmul.f32 %v3890_v21, %v1526_v43  ;;  %2204 = vmatmul.f32.gmra.mxu1 %v1760_v24  ;;  %v1761_v62 = vsub.f32 %v1759_v36, %v1760_v24  ;;  %v1537_v21 = vand.u32 2147483647, %v3965_v33  ;;  %vm3998_vm14 = vmor %vm1533_vm13, %vm1534_vm12 }
 0x41f   : > { %v2908_v31 = vpop.eup %2907  ;;  %v1530_v14 = vsub.f32 1.0, %v1529_v41 }
 0x420   : > { %v1544_v32 = vmul.f32 %v2908_v31, %v3970_v44  ;;  %v1357_v55 = vpop.xlane.xlu0 %1356  ;;  %v3989_v6 = vand.u32 4294901760, %v1683_v46  ;;  %v1762_v4 = vand.u32 4294901760, %v1761_v62  ;;  %v3996_v35 = vpop.eup %2909  ;;  %vm1549_vm15 = vweird.f32 %v2908_v31 }
 0x421   : > { %v1531_v20 = vmul.f32 %v2906_v63, %v1530_v14  ;;  %v1373_v25 = vsub.f32 %v3903_v42, %v1357_v55  ;;  %v1552_v42 = vand.u32 2147483647, %v3970_v44  ;;  %vm1538_vm0 = vcmp.eq.f32.partialorder %v1537_v21, 8.507059e+37  ;;  %vm1550_vm3 = vmor %vm1548_vm2, %vm1549_vm15 }
 0x422   : > { %v1545_v57 = vsub.f32 1.0, %v1544_v32  ;;  %v1767_v40 = vsub.f32 %v1683_v46, %v3989_v6  ;;  %1763 = vmatmul.f32.gmra.mxu2 %v1762_v4  ;;  %1972 = vmatmul.f32.gmra.mxu3 %v3989_v6 }
 0x423   : > { %v1532_v10 = vadd.f32 %v2906_v63, %v1531_v20  ;;  %v1404_v59 = vmul.f32 1.442695, %v1373_v25  ;;  %vm1553_vm4 = vcmp.eq.f32.partialorder %v1552_v42, 8.507059e+37 }
 0x424   : > { %v1546_v19 = vmul.f32 %v2908_v31, %v1545_v57  ;;  %v1768_v22 = vand.u32 4294901760, %v1767_v40  ;;  %1432 = vadd.xlane.f32.xlu2 %v3996_v35  ;;  %2091 = vmatmul.f32.gmra.mxu0 %v1767_v40 }
 0x425   : > { %v1536_v16 = vsel %vm3998_vm14, %v2906_v63, %v1532_v10  ;;  %2911 = vpow2.f32 %v1404_v59 }
 0x426   : > { %v1547_v26 = vadd.f32 %v2908_v31, %v1546_v19  ;;  %v1769_v33 = vsub.f32 %v1767_v40, %v1768_v22  ;;  %v1541_v3 = vsel %vm1538_vm0, %v1540_v39, %v1536_v16  ;;  %2210 = vmatmul.f32.gmra.mxu1 %v1768_v22 }
 0x427   : > { %v1684_v47 = vmul.f32 %v3896_v9, %v1541_v3  ;;  %v1571_v9 = vsel %vm1568_vm5, %v1570_v52, %v1566_v18 }
 0x428   : > { %v1551_v37 = vsel %vm1550_vm3, %v2908_v31, %v1547_v26  ;;  %v1770_v34 = vand.u32 4294901760, %v1769_v33  ;;  %v1686_v0 = vmul.f32 %v3875_v61, %v1571_v9 }
 0x429   : > { %v4022_v53 = vand.u32 4294901760, %v1684_v47  ;;  %v1556_v2 = vsel %vm1553_vm4, %v1555_v50, %v1551_v37 }
 0x42a   : > { %v1685_v44 = vmul.f32 %v3900_v17, %v1556_v2  ;;  %1771 = vmatmul.f32.gmra.mxu2 %v1770_v34  ;;  %v4034_v41 = vand.u32 4294901760, %v1686_v0 }
 0x42b   : > { %v4025_v29 = vpop.eup %2911  ;;  %v1775_v27 = vsub.f32 %v1684_v47, %v4022_v53  ;;  %1976 = vmatmul.f32.gmra.mxu3 %v4022_v53 }
 0x42c   : > { %v4029_v15 = vand.u32 4294901760, %v1685_v44  ;;  %1436 = vadd.xlane.f32.xlu1 %v4025_v29  ;;  %v1791_v24 = vsub.f32 %v1686_v0, %v4034_v41 }
 0x42d   : > { %v1776_v49 = vand.u32 4294901760, %v1775_v27  ;;  %2096 = vmatmul.f32.gmra.mxu0 %v1775_v27 }
 0x42e   : > { %v1783_v63 = vsub.f32 %v1685_v44, %v4029_v15  ;;  %v1792_v31 = vand.u32 4294901760, %v1791_v24 }
 0x42f   : > { %v1777_v5 = vsub.f32 %v1775_v27, %v1776_v49  ;;  %2216 = vmatmul.f32.gmra.mxu1 %v1776_v49 }
 0x430   : > { %v1784_v36 = vand.u32 4294901760, %v1783_v63  ;;  %v1793_v61 = vsub.f32 %v1791_v24, %v1792_v31 }
 0x431   : > { %v1778_v17 = vand.u32 4294901760, %v1777_v5 }
 0x432   : > { %v1785_v43 = vsub.f32 %v1783_v63, %v1784_v36  ;;  %v1794_v54 = vand.u32 4294901760, %v1793_v61 }
 0x433   : > { %1779 = vmatmul.f32.gmra.mxu2 %v1778_v17  ;;  %1980 = vmatmul.f32.gmra.mxu3 %v4029_v15 }
 0x434   : > { %v1786_v46 = vand.u32 4294901760, %v1785_v43 }
 0x435   : > { %2101 = vmatmul.f32.gmra.mxu0 %v1783_v63 }
 0x437   : > { %2222 = vmatmul.f32.gmra.mxu1 %v1784_v36 }
 0x43b   : > { %1787 = vmatmul.f32.gmra.mxu2 %v1786_v46  ;;  %1984 = vmatmul.f32.gmra.mxu3 %v4034_v41 }
 0x43d   : > { %2106 = vmatmul.f32.gmra.mxu0 %v1791_v24 }
 0x43f   : > { %2228 = vmatmul.f32.gmra.mxu1 %v1792_v31 }
 0x443   : > { %1795 = vmatmul.f32.gmra.mxu2 %v1794_v54 }
 0x458   : > { %v1429_v42 = vpop.xlane.xlu0 %1428 }
 0x459   : > { %v1614_v49 = vand.u32 2147483648, %v1429_v42  ;;  %vm1608_vm11 = vweird.f32 %v1429_v42  ;;  %v1612_v17 = vand.u32 2147483647, %v1429_v42 }
 0x45b   : > { %v1615_v46 = vor.u32 1.1754944e-38, %v1614_v49  ;;  %vm1613_vm14 = vcmp.eq.f32.partialorder %v1612_v17, 8.507059e+37 }
 0x45f   : > { %v1355_v14 = vpop.xlane.xlu1 %1354 }
 0x460   : > { %v1372_v56 = vsub.f32 %v3940_v12, %v1355_v14 }
 0x462   : > { %v1402_v7 = vmul.f32 1.442695, %v1372_v56  ;;  %v4043_v11 = vpop.f32.mrf.mxu3 }
 0x464   : > { %2913 = vpow2.f32 %v1402_v7 }
 0x467   : > { %v1425_v32 = vpop.xlane.xlu1 %1424 }
 0x468   : > { %2915 = vrcp.f32 %v1425_v32  ;;  %v1584_v25 = vand.u32 2147483648, %v1425_v32  ;;  %v1582_v4 = vand.u32 2147483647, %v1425_v32  ;;  %vm1578_vm7 = vweird.f32 %v1425_v32 }
 0x469   : > { %2917 = vrcp.f32 %v1429_v42 }
 0x46a   : > { %v4040_v55 = vpop.eup %2913  ;;  %v1585_v10 = vor.u32 1.1754944e-38, %v1584_v25  ;;  %vm1583_vm9 = vcmp.eq.f32.partialorder %v1582_v4, 8.507059e+37  ;;  %v4050_v23 = vpop.f32.mrf.mxu2 }
 0x46b   : > { %1434 = vadd.xlane.f32.xlu0 %v4040_v55  ;;  %v4052_v51 = vpop.f32.mrf.mxu3 }
 0x46e   : > { %v2916_v62 = vpop.eup %2915 }
 0x46f   : > { %v1574_v20 = vmul.f32 %v2916_v62, %v1425_v32  ;;  %vm1579_vm6 = vweird.f32 %v2916_v62  ;;  %v2918_v33 = vpop.eup %2917 }
 0x470   : > { %vm1580_vm8 = vmor %vm1578_vm7, %vm1579_vm6  ;;  %v1604_v3 = vmul.f32 %v2918_v33, %v1429_v42  ;;  %vm1609_vm10 = vweird.f32 %v2918_v33 }
 0x471   : > { %v1575_v21 = vsub.f32 1.0, %v1574_v20  ;;  %vm1610_vm12 = vmor %vm1608_vm11, %vm1609_vm10 }
 0x472   : > { %v1605_v18 = vsub.f32 1.0, %v1604_v3 }
 0x473   : > { %v1576_v57 = vmul.f32 %v2916_v62, %v1575_v21  ;;  %v4054_v50 = vpop.f32.mrf.mxu2  ;;  %v4056_v47 = vpop.f32.mrf.mxu3 }
 0x474   : > { %v1606_v52 = vmul.f32 %v2918_v33, %v1605_v18 }
 0x475   : > { %v1577_v40 = vadd.f32 %v2916_v62, %v1576_v57 }
 0x476   : > { %v1607_v9 = vadd.f32 %v2918_v33, %v1606_v52 }
 0x477   : > { %v1581_v12 = vsel %vm1580_vm8, %v2916_v62, %v1577_v40 }
 0x478   : > { %v1586_v39 = vsel %vm1583_vm9, %v1585_v10, %v1581_v12  ;;  %v1611_v24 = vsel %vm1610_vm12, %v2918_v33, %v1607_v9 }
 0x479   : > { %v1687_v59 = vmul.f32 %v3948_v58, %v1586_v39  ;;  %v1616_v7 = vsel %vm1613_vm14, %v1615_v46, %v1611_v24 }
 0x47a   : > { %v1689_v12 = vmul.f32 %v3923_v30, %v1616_v7 }
 0x47b   : > { %v4046_v1 = vand.u32 4294901760, %v1687_v59  ;;  %v1431_v58 = vpop.xlane.xlu1 %1430  ;;  %v4058_v44 = vpop.f32.mrf.mxu2 }
 0x47c   : > { %2919 = vrcp.f32 %v1431_v58  ;;  %v4060_v63 = vpop.f32.mrf.mxu3  ;;  %v1629_v4 = vand.u32 2147483648, %v1431_v58  ;;  %vm1623_vm3 = vweird.f32 %v1431_v58  ;;  %v1627_v39 = vand.u32 2147483647, %v1431_v58 }
 0x47d   : > { %1988 = vmatmul.f32.gmra.mxu3 %v4046_v1  ;;  %v1799_v19 = vsub.f32 %v1687_v59, %v4046_v1  ;;  %v4070_v33 = vand.u32 4294901760, %v1689_v12 }
 0x47e   : > { %vm1628_vm5 = vcmp.eq.f32.partialorder %v1627_v39, 8.507059e+37 }
 0x47f   : > { %2111 = vmatmul.f32.gmra.mxu0 %v1799_v19  ;;  %v1800_v22 = vand.u32 4294901760, %v1799_v19 }
 0x481   : > { %2234 = vmatmul.f32.gmra.mxu1 %v1800_v22  ;;  %v1801_v16 = vsub.f32 %v1799_v19, %v1800_v22  ;;  %v1630_v22 = vor.u32 1.1754944e-38, %v1629_v4 }
 0x482   : > { %v2920_v34 = vpop.eup %2919 }
 0x483   : > { %v1802_v26 = vand.u32 4294901760, %v1801_v16  ;;  %v1619_v2 = vmul.f32 %v2920_v34, %v1431_v58  ;;  %vm1624_vm1 = vweird.f32 %v2920_v34  ;;  %v4062_v21 = vpop.f32.mrf.mxu2 }
 0x484   : > { %vm1625_vm4 = vmor %vm1623_vm3, %vm1624_vm1 }
 0x485   : > { %1803 = vmatmul.f32.gmra.mxu2 %v1802_v26  ;;  %v1620_v0 = vsub.f32 1.0, %v1619_v2 }
 0x487   : > { %v1621_v61 = vmul.f32 %v2920_v34, %v1620_v0 }
 0x489   : > { %v1622_v20 = vadd.f32 %v2920_v34, %v1621_v61 }
 0x48b   : > { %v1626_v42 = vsel %vm1625_vm4, %v2920_v34, %v1622_v20 }
 0x48c   : > { %v1631_v18 = vsel %vm1628_vm5, %v1630_v22, %v1626_v42 }
 0x48f   : > { %v1427_v37 = vpop.xlane.xlu2 %1426 }
 0x490   : > { %2921 = vrcp.f32 %v1427_v37  ;;  %v1599_v31 = vand.u32 2147483648, %v1427_v37  ;;  %v1597_v14 = vand.u32 2147483647, %v1427_v37  ;;  %vm1593_vm15 = vweird.f32 %v1427_v37 }
 0x492   : > { %v1600_v32 = vor.u32 1.1754944e-38, %v1599_v31  ;;  %vm1598_vm2 = vcmp.eq.f32.partialorder %v1597_v14, 8.507059e+37 }
 0x496   : > { %v2922_v27 = vpop.eup %2921 }
 0x497   : > { %v1589_v5 = vmul.f32 %v2922_v27, %v1427_v37  ;;  %v1433_v36 = vpop.xlane.xlu2 %1432  ;;  %vm1594_vm13 = vweird.f32 %v2922_v27 }
 0x498   : > { %2923 = vrcp.f32 %v1433_v36  ;;  %vm1595_vm0 = vmor %vm1593_vm15, %vm1594_vm13  ;;  %v1644_v37 = vand.u32 2147483648, %v1433_v36  ;;  %vm1638_vm7 = vweird.f32 %v1433_v36  ;;  %v1642_v34 = vand.u32 2147483647, %v1433_v36 }
 0x499   : > { %v1590_v43 = vsub.f32 1.0, %v1589_v5 }
 0x49a   : > { %v1645_v0 = vor.u32 1.1754944e-38, %v1644_v37  ;;  %vm1643_vm9 = vcmp.eq.f32.partialorder %v1642_v34, 8.507059e+37 }
 0x49b   : > { %v1591_v54 = vmul.f32 %v2922_v27, %v1590_v43 }
 0x49d   : > { %v1592_v56 = vadd.f32 %v2922_v27, %v1591_v54  ;;  %v4064_v57 = vpop.f32.mrf.mxu3 }
 0x49e   : > { %v2924_v62 = vpop.eup %2923 }
 0x49f   : > { %v1596_v25 = vsel %vm1595_vm0, %v2922_v27, %v1592_v56  ;;  %v1634_v40 = vmul.f32 %v2924_v62, %v1433_v36  ;;  %vm1639_vm6 = vweird.f32 %v2924_v62  ;;  %v1690_v27 = vmul.f32 %v3954_v13, %v1631_v18 }
 0x4a0   : > { %v1601_v10 = vsel %vm1598_vm2, %v1600_v32, %v1596_v25  ;;  %vm1640_vm8 = vmor %vm1638_vm7, %vm1639_vm6  ;;  %vm2596_vm2 = vcmask 130048  }
 0x4a1   : > { %v1635_v59 = vsub.f32 1.0, %v1634_v40  ;;  %v1688_v19 = vmul.f32 %v3975_v60, %v1601_v10  ;;  %v1815_v60 = vsub.f32 %v1689_v12, %v4070_v33  ;;  %v4080_v43 = vand.u32 4294901760, %v1690_v27 }
 0x4a3   : > { %v1636_v16 = vmul.f32 %v2924_v62, %v1635_v59  ;;  %v4068_v26 = vand.u32 4294901760, %v1688_v19  ;;  %v1816_v17 = vand.u32 4294901760, %v1815_v60  ;;  %v1823_v13 = vsub.f32 %v1690_v27, %v4080_v43 }
 0x4a5   : > { %1992 = vmatmul.f32.gmra.mxu3 %v4068_v26  ;;  %v1807_v3 = vsub.f32 %v1688_v19, %v4068_v26  ;;  %v1637_v30 = vadd.f32 %v2924_v62, %v1636_v16  ;;  %v4074_v58 = vpop.f32.mrf.mxu2  ;;  %v4077_v52 = vpop.f32.mrf.mxu3  ;;  %v1817_v46 = vsub.f32 %v1815_v60, %v1816_v17  ;;  %v1824_v14 = vand.u32 4294901760, %v1823_v13 }
 0x4a6   : > { %v1437_v19 = vpop.xlane.xlu1 %1436 }
 0x4a7   : > { %2116 = vmatmul.f32.gmra.mxu0 %v1807_v3  ;;  %v1808_v2 = vand.u32 4294901760, %v1807_v3  ;;  %v1641_v9 = vsel %vm1640_vm8, %v2924_v62, %v1637_v30  ;;  %v1818_v54 = vand.u32 4294901760, %v1817_v46  ;;  %v1825_v32 = vsub.f32 %v1823_v13, %v1824_v14 }
 0x4a8   : > { %v1646_v24 = vsel %vm1643_vm9, %v1645_v0, %v1641_v9  ;;  %2925 = vrcp.f32 %v1437_v19  ;;  %vm1668_vm11 = vweird.f32 %v1437_v19  ;;  %v1672_v34 = vand.u32 2147483647, %v1437_v19 }
 0x4a9   : > { %2240 = vmatmul.f32.gmra.mxu1 %v1808_v2  ;;  %v1809_v49 = vsub.f32 %v1807_v3, %v1808_v2  ;;  %v1691_v31 = vmul.f32 %v3996_v35, %v1646_v24  ;;  %v1826_v35 = vand.u32 4294901760, %v1825_v32 }
 0x4aa   : > { %vm1673_vm13 = vcmp.eq.f32.partialorder %v1672_v34, 8.507059e+37 }
 0x4ab   : > { %v1810_v5 = vand.u32 4294901760, %v1809_v49  ;;  %v4089_v56 = vand.u32 4294901760, %v1691_v31 }
 0x4ad   : > { %1996 = vmatmul.f32.gmra.mxu3 %v4070_v33  ;;  %1811 = vmatmul.f32.gmra.mxu2 %v1810_v5  ;;  %v4083_v36 = vpop.f32.mrf.mxu2  ;;  %v1831_v62 = vsub.f32 %v1691_v31, %v4089_v56 }
 0x4ae   : > { %v4087_v61 = vpop.f32.mrf.mxu3  ;;  %v2926_v42 = vpop.eup %2925 }
 0x4af   : > { %2121 = vmatmul.f32.gmra.mxu0 %v1815_v60  ;;  %v1832_v25 = vand.u32 4294901760, %v1831_v62  ;;  %v1664_v22 = vmul.f32 %v2926_v42, %v1437_v19  ;;  %vm1669_vm10 = vweird.f32 %v2926_v42  ;;  %v1674_v60 = vand.u32 2147483648, %v1437_v19 }
 0x4b0   : > { %vm1670_vm12 = vmor %vm1668_vm11, %vm1669_vm10 }
 0x4b1   : > { %2246 = vmatmul.f32.gmra.mxu1 %v1816_v17  ;;  %v1833_v40 = vsub.f32 %v1831_v62, %v1832_v25  ;;  %v1665_v16 = vsub.f32 1.0, %v1664_v22  ;;  %v1675_v49 = vor.u32 1.1754944e-38, %v1674_v60 }
 0x4b3   : > { %v1834_v10 = vand.u32 4294901760, %v1833_v40  ;;  %v1666_v18 = vmul.f32 %v2926_v42, %v1665_v16 }
 0x4b5   : > { %2000 = vmatmul.f32.gmra.mxu3 %v4080_v43  ;;  %1819 = vmatmul.f32.gmra.mxu2 %v1818_v54  ;;  %v1667_v30 = vadd.f32 %v2926_v42, %v1666_v18 }
 0x4b6   : > { %v4092_v7 = vpop.f32.mrf.mxu2  ;;  %v4095_v20 = vpop.f32.mrf.mxu3 }
 0x4b7   : > { %2126 = vmatmul.f32.gmra.mxu0 %v1823_v13  ;;  %v1671_v27 = vsel %vm1670_vm12, %v2926_v42, %v1667_v30 }
 0x4b8   : > { %v1676_v24 = vsel %vm1673_vm13, %v1675_v49, %v1671_v27 }
 0x4b9   : > { %2252 = vmatmul.f32.gmra.mxu1 %v1824_v14  ;;  %v1693_v54 = vmul.f32 %v4025_v29, %v1676_v24  ;;  %v1958_v24 = vadd.f32 %v4052_v51, %v4054_v50 }
 0x4bd   : > { %2004 = vmatmul.f32.gmra.mxu3 %v4089_v56  ;;  %1827 = vmatmul.f32.gmra.mxu2 %v1826_v35  ;;  %v4106_v35 = vand.u32 4294901760, %v1693_v54 }
 0x4be   : > { %v4098_v4 = vpop.f32.mrf.mxu2  ;;  %v1985_v12 = vpop.f32.mrf.mxu3 }
 0x4bf   : > { %2131 = vmatmul.f32.gmra.mxu0 %v1831_v62 }
 0x4c1   : > { %2258 = vmatmul.f32.gmra.mxu1 %v1832_v25 }
 0x4c5   : > { %1835 = vmatmul.f32.gmra.mxu2 %v1834_v10  ;;  %v1847_v10 = vsub.f32 %v1693_v54, %v4106_v35 }
 0x4c6   : > { %v1796_v39 = vpop.f32.mrf.mxu2 }
 0x4c7   : > { %v4100_v59 = vadd.f32 %v1985_v12, %v1796_v39  ;;  %v1848_v19 = vand.u32 4294901760, %v1847_v10 }
 0x4c9   : > { %v1849_v29 = vsub.f32 %v1847_v10, %v1848_v19 }
 0x4de   : > { %v1435_v3 = vpop.xlane.xlu0 %1434 }
 0x4df   : > { %2927 = vrcp.f32 %v1435_v3  ;;  %v1659_v0 = vand.u32 2147483648, %v1435_v3  ;;  %v1657_v17 = vand.u32 2147483647, %v1435_v3  ;;  %vm1653_vm15 = vweird.f32 %v1435_v3 }
 0x4e1   : > { %v1660_v13 = vor.u32 1.1754944e-38, %v1659_v0  ;;  %vm1658_vm1 = vcmp.eq.f32.partialorder %v1657_v17, 8.507059e+37 }
 0x4e5   : > { %v2928_v37 = vpop.eup %2927 }
 0x4e6   : > { %v1649_v2 = vmul.f32 %v2928_v37, %v1435_v3  ;;  %vm1654_vm14 = vweird.f32 %v2928_v37 }
 0x4e7   : > { %vm1655_vm0 = vmor %vm1653_vm15, %vm1654_vm14 }
 0x4e8   : > { %v1650_v9 = vsub.f32 1.0, %v1649_v2 }
 0x4ea   : > { %v1651_v5 = vmul.f32 %v2928_v37, %v1650_v9 }
 0x4ec   : > { %v1652_v46 = vadd.f32 %v2928_v37, %v1651_v5 }
 0x4ee   : > { %v1656_v31 = vsel %vm1655_vm0, %v2928_v37, %v1652_v46 }
 0x4ef   : > { %v1661_v14 = vsel %vm1658_vm1, %v1660_v13, %v1656_v31 }
 0x4f0   : > { %v1692_v32 = vmul.f32 %v4040_v55, %v1661_v14  ;;  %v1850_v55 = vand.u32 4294901760, %v1849_v29 }
 0x4f2   : > { %v4104_v62 = vand.u32 4294901760, %v1692_v32 }
 0x4f4   : > { %2008 = vmatmul.f32.gmra.mxu3 %v4104_v62  ;;  %v1839_v25 = vsub.f32 %v1692_v32, %v4104_v62 }
 0x4f6   : > { %2136 = vmatmul.f32.gmra.mxu0 %v1839_v25  ;;  %v1840_v40 = vand.u32 4294901760, %v1839_v25 }
 0x4f8   : > { %2264 = vmatmul.f32.gmra.mxu1 %v1840_v40  ;;  %v1841_v12 = vsub.f32 %v1839_v25, %v1840_v40 }
 0x4fa   : > { %v1842_v39 = vand.u32 4294901760, %v1841_v12 }
 0x4fc   : > { %1843 = vmatmul.f32.gmra.mxu2 %v1842_v39  ;;  %2012 = vmatmul.f32.gmra.mxu3 %v4106_v35 }
 0x4fe   : > { %2141 = vmatmul.f32.gmra.mxu0 %v1847_v10 }
 0x500   : > { %2270 = vmatmul.f32.gmra.mxu1 %v1848_v19  ;;  %v1989_v42 = vpop.f32.mrf.mxu3 }
 0x504   : > { %1851 = vmatmul.f32.gmra.mxu2 %v1850_v55  ;;  %2436 = vmatmul.f32.vlgmr.msrb.gmra.mxu3 %v3917_v28 }
 0x508   : > { %v1804_v22 = vpop.f32.mrf.mxu2 }
 0x509   : > { %v4113_v16 = vadd.f32 %v1989_v42, %v1804_v22  ;;  %v1966_v22 = vadd.f32 %v4060_v63, %v4062_v21 }
 0x50c   : > { %2339 = vmatmul.f32.vlgmr.msrb.gmra.mxu2 %v3917_v28  ;;  %2440 = vmatmul.f32.gmra.mxu3 %v3932_v38 }
 0x514   : > { %2343 = vmatmul.f32.gmra.mxu2 %v3932_v38  ;;  %2444 = vmatmul.f32.gmra.mxu3 %v3935_v8 }
 0x51c   : > { %2347 = vmatmul.f32.gmra.mxu2 %v3935_v8  ;;  %2448 = vmatmul.f32.gmra.mxu3 %v3945_v45 }
 0x524   : > { %2351 = vmatmul.f32.gmra.mxu2 %v3945_v45  ;;  %2452 = vmatmul.f32.gmra.mxu3 %v3973_v48 }
 0x528   : > { %v1993_v3 = vpop.f32.mrf.mxu3 }
 0x52c   : > { %2355 = vmatmul.f32.gmra.mxu2 %v3973_v48  ;;  %2456 = vmatmul.f32.gmra.mxu3 %v3989_v6 }
 0x530   : > { %v1812_v28 = vpop.f32.mrf.mxu2  ;;  %v1997_v38 = vpop.f32.mrf.mxu3 }
 0x531   : > { %v4125_v18 = vadd.f32 %v1993_v3, %v1812_v28 }
 0x534   : > { %2359 = vmatmul.f32.gmra.mxu2 %v3989_v6  ;;  %2460 = vmatmul.f32.gmra.mxu3 %v4022_v53 }
 0x538   : > { %v1820_v8 = vpop.f32.mrf.mxu2  ;;  %v2001_v45 = vpop.f32.mrf.mxu3 }
 0x539   : > { %v4129_v30 = vadd.f32 %v1997_v38, %v1820_v8 }
 0x53c   : > { %2363 = vmatmul.f32.gmra.mxu2 %v4022_v53  ;;  %2464 = vmatmul.f32.gmra.mxu3 %v4029_v15  ;;  %v2067_v53 = vpop.f32.mrf.mxu0 }
 0x540   : > { %v1828_v37 = vpop.f32.mrf.mxu2  ;;  %v2005_v60 = vpop.f32.mrf.mxu3 }
 0x541   : > { %v4133_v48 = vadd.f32 %v2001_v45, %v1828_v37 }
 0x544   : > { %2367 = vmatmul.f32.gmra.mxu2 %v4029_v15  ;;  %2468 = vmatmul.f32.gmra.mxu3 %v4034_v41  ;;  %v2181_v15 = vpop.f32.mrf.mxu1 }
 0x548   : > { %v1836_v6 = vpop.f32.mrf.mxu2 }
 0x549   : > { %v4137_v34 = vadd.f32 %v2005_v60, %v1836_v6 }
 0x54c   : > { %2371 = vmatmul.f32.gmra.mxu2 %v4034_v41  ;;  %2472 = vmatmul.f32.gmra.mxu3 %v4046_v1  ;;  %v2187_v2 = vpop.f32.mrf.mxu1 }
 0x554   : > { %2375 = vmatmul.f32.gmra.mxu2 %v4046_v1  ;;  %2476 = vmatmul.f32.gmra.mxu3 %v4068_v26  ;;  %v2072_v1 = vpop.f32.mrf.mxu0  ;;  %v2193_v17 = vpop.f32.mrf.mxu1 }
 0x55c   : > { %2379 = vmatmul.f32.gmra.mxu2 %v4068_v26  ;;  %2480 = vmatmul.f32.gmra.mxu3 %v4070_v33  ;;  %v2077_v27 = vpop.f32.mrf.mxu0  ;;  %v2199_v32 = vpop.f32.mrf.mxu1 }
 0x564   : > { %2383 = vmatmul.f32.gmra.mxu2 %v4070_v33  ;;  %2484 = vmatmul.f32.gmra.mxu3 %v4080_v43  ;;  %v2082_v54 = vpop.f32.mrf.mxu0  ;;  %v2205_v29 = vpop.f32.mrf.mxu1 }
 0x565   : > { %v2083_v37 = vadd.f32 %v2082_v54, %v1966_v22 }
 0x56c   : > { %2387 = vmatmul.f32.gmra.mxu2 %v4080_v43  ;;  %2488 = vmatmul.f32.gmra.mxu3 %v4089_v56  ;;  %v2087_v10 = vpop.f32.mrf.mxu0 }
 0x574   : > { %2391 = vmatmul.f32.gmra.mxu2 %v4089_v56  ;;  %2492 = vmatmul.f32.gmra.mxu3 %v4104_v62  ;;  %v1954_v56 = vadd.f32 %v4043_v11, %v4050_v23  ;;  %v2073_v11 = vadd.f32 %v2072_v1, %v1958_v24  ;;  %v2092_v60 = vpop.f32.mrf.mxu0  ;;  %v2200_v1 = vadd.f32 %v2199_v32, %v2083_v37 }
 0x576   : > { %v2068_v5 = vadd.f32 %v2067_v53, %v1954_v56  ;;  %v2188_v51 = vadd.f32 %v2187_v2, %v2073_v11  ;;  %v2211_v53 = vpop.f32.mrf.mxu1 }
 0x577   : > { %v2009_v41 = vpop.f32.mrf.mxu3 }
 0x578   : > { %v2182_v46 = vadd.f32 %v2181_v15, %v2068_v5  ;;  %v1970_v15 = vadd.f32 %v4064_v57, %v4074_v58  ;;  %v1974_v57 = vadd.f32 %v4077_v52, %v4083_v36  ;;  %v1978_v52 = vadd.f32 %v4087_v61, %v4092_v7 }
 0x579   : > { %v1982_v61 = vadd.f32 %v4095_v20, %v4098_v4 }
 0x57a   : > { %v2093_v32 = vadd.f32 %v2092_v60, %v1974_v57 }
 0x57c   : > { %2395 = vmatmul.f32.gmra.mxu2 %v4104_v62  ;;  %2496 = vmatmul.f32.gmra.mxu3 %v4106_v35  ;;  %v2097_v5 = vpop.f32.mrf.mxu0 }
 0x57e   : > { %v2217_v11 = vpop.f32.mrf.mxu1 }
 0x57f   : > { %v1844_v26 = vpop.f32.mrf.mxu2  ;;  %v2013_v33 = vpop.f32.mrf.mxu3 }
 0x580   : > { %v4153_v43 = vadd.f32 %v2009_v41, %v1844_v26 }
 0x584   : > { %2399 = vmatmul.f32.gmra.mxu2 %v4106_v35  ;;  %v1962_v35 = vadd.f32 %v4056_v47, %v4058_v44 }
 0x586   : > { %v2078_v39 = vadd.f32 %v2077_v27, %v1962_v35 }
 0x587   : > { %v1852_v9 = vpop.f32.mrf.mxu2  ;;  %v2437_v49 = vpop.f32.mrf.mxu3 }
 0x588   : > { %v4158_v0 = vadd.f32 %v2013_v33, %v1852_v9  ;;  %v2194_v47 = vadd.f32 %v2193_v17, %v2078_v39  ;;  %v2088_v9 = vadd.f32 %v2087_v10, %v1970_v15 }
 0x58f   : > { %v2340_v13 = vpop.f32.mrf.mxu2  ;;  %v2441_v31 = vpop.f32.mrf.mxu3 }
 0x590   : > { %v2341_v14 = vadd.f32 %v2340_v13, %v2182_v46  ;;  %v2206_v46 = vadd.f32 %v2205_v29, %v2088_v9  ;;  %v2098_v29 = vadd.f32 %v2097_v5, %v1978_v52 }
 0x592   : > { %v2438_v23 = vadd.f32 %v2437_v49, %v2341_v14 }
 0x594   : > { %v2516_v62 = vmin.f32 %v2438_v23, 0.0  ;;  %vm2500_vm3 = vcmp.gt.f32.partialorder %v2438_v23, 0.0 }
 0x596   : > { %v2532_v25 = vmul.f32 1.442695, %v2516_v62 }
 0x597   : > { %v2344_v50 = vpop.f32.mrf.mxu2  ;;  %v2445_v40 = vpop.f32.mrf.mxu3 }
 0x598   : > { %2929 = vpow2.f32 %v2532_v25  ;;  %v2345_v12 = vadd.f32 %v2344_v50, %v2188_v51  ;;  %v2102_v51 = vpop.f32.mrf.mxu0  ;;  %v2212_v50 = vadd.f32 %v2211_v53, %v2093_v32 }
 0x599   : > { %v2103_v60 = vadd.f32 %v2102_v51, %v1982_v61 }
 0x59a   : > { %v2442_v19 = vadd.f32 %v2441_v31, %v2345_v12 }
 0x59c   : > { %v2517_v55 = vmin.f32 %v2442_v19, 0.0  ;;  %vm2501_vm4 = vcmp.gt.f32.partialorder %v2442_v19, 0.0 }
 0x59e   : > { %v2930_v42 = vpop.eup %2929  ;;  %v2534_v3 = vmul.f32 1.442695, %v2517_v55 }
 0x59f   : > { %v2745_v44 = vadd.f32 -1.0, %v2930_v42  ;;  %v2348_v28 = vpop.f32.mrf.mxu2  ;;  %v2449_v38 = vpop.f32.mrf.mxu3 }
 0x5a0   : > { %2931 = vpow2.f32 %v2534_v3  ;;  %v2349_v8 = vadd.f32 %v2348_v28, %v2194_v47  ;;  %v2223_v42 = vpop.f32.mrf.mxu1  ;;  %v2218_v47 = vadd.f32 %v2217_v11, %v2098_v29 }
 0x5a1   : > { %v2580_v45 = vsel %vm2500_vm3, %v2438_v23, %v2745_v44  ;;  %v2224_v20 = vadd.f32 %v2223_v42, %v2103_v60 }
 0x5a2   : > { %2597 = vst.msk [vmem:[%s4172_s20] sm:$0xff] %vm2596_vm2, %v2580_v45  ;;  %v2446_v63 = vadd.f32 %v2445_v40, %v2349_v8  ;;  %v2107_v45 = vpop.f32.mrf.mxu0 }
 0x5a4   : > { %v2518_v21 = vmin.f32 %v2446_v63, 0.0  ;;  %vm2502_vm5 = vcmp.gt.f32.partialorder %v2446_v63, 0.0 }
 0x5a6   : > { %v2932_v6 = vpop.eup %2931  ;;  %v2536_v41 = vmul.f32 1.442695, %v2518_v21 }
 0x5a7   : > { %v2746_v26 = vadd.f32 -1.0, %v2932_v6  ;;  %v2352_v33 = vpop.f32.mrf.mxu2  ;;  %v2453_v2 = vpop.f32.mrf.mxu3 }
 0x5a8   : > { %2933 = vpow2.f32 %v2536_v41  ;;  %v2353_v56 = vadd.f32 %v2352_v33, %v2200_v1  ;;  %v2229_v6 = vpop.f32.mrf.mxu1 }
 0x5a9   : > { %v2581_v27 = vsel %vm2501_vm4, %v2442_v19, %v2746_v26 }
 0x5aa   : > { %2598 = vst.msk [vmem:[%s4172_s20 + $0x8] sm:$0xff] %vm2596_vm2, %v2581_v27  ;;  %v2450_v49 = vadd.f32 %v2449_v38, %v2353_v56  ;;  %v2112_v33 = vpop.f32.mrf.mxu0  ;;  %v2108_v56 = vadd.f32 %v2107_v45, %v4100_v59 }
 0x5ac   : > { %v2519_v17 = vmin.f32 %v2450_v49, 0.0  ;;  %vm2503_vm6 = vcmp.gt.f32.partialorder %v2450_v49, 0.0 }
 0x5ae   : > { %v2934_v24 = vpop.eup %2933  ;;  %v2538_v58 = vmul.f32 1.442695, %v2519_v17 }
 0x5af   : > { %v2747_v13 = vadd.f32 -1.0, %v2934_v24  ;;  %v2356_v31 = vpop.f32.mrf.mxu2  ;;  %v2457_v54 = vpop.f32.mrf.mxu3  ;;  %v2230_v24 = vadd.f32 %v2229_v6, %v2108_v56 }
 0x5b0   : > { %2935 = vpow2.f32 %v2538_v58  ;;  %v2357_v14 = vadd.f32 %v2356_v31, %v2206_v46 }
 0x5b1   : > { %v2582_v23 = vsel %vm2502_vm5, %v2446_v63, %v2747_v13 }
 0x5b2   : > { %2599 = vst.msk [vmem:[%s4172_s20 + $0x10] sm:$0xff] %vm2596_vm2, %v2582_v23  ;;  %v2454_v62 = vadd.f32 %v2453_v2, %v2357_v14  ;;  %v2117_v31 = vpop.f32.mrf.mxu0  ;;  %v2113_v14 = vadd.f32 %v2112_v33, %v4113_v16 }
 0x5b4   : > { %v2520_v35 = vmin.f32 %v2454_v62, 0.0  ;;  %vm2504_vm7 = vcmp.gt.f32.partialorder %v2454_v62, 0.0 }
 0x5b6   : > { %v2936_v25 = vpop.eup %2935  ;;  %v2540_v36 = vmul.f32 1.442695, %v2520_v35 }
 0x5b7   : > { %v2748_v40 = vadd.f32 -1.0, %v2936_v25  ;;  %v2360_v10 = vpop.f32.mrf.mxu2  ;;  %v2461_v12 = vpop.f32.mrf.mxu3 }
 0x5b8   : > { %2937 = vpow2.f32 %v2540_v36  ;;  %v2361_v39 = vadd.f32 %v2360_v10, %v2212_v50 }
 0x5b9   : > { %v2583_v19 = vsel %vm2503_vm6, %v2450_v49, %v2748_v40  ;;  %v2235_v49 = vpop.f32.mrf.mxu1  ;;  %v2118_v40 = vadd.f32 %v2117_v31, %v4125_v18 }
 0x5ba   : > { %2600 = vst.msk [vmem:[%s4172_s20 + $0x18] sm:$0xff] %vm2596_vm2, %v2583_v19  ;;  %v2458_v55 = vadd.f32 %v2457_v54, %v2361_v39  ;;  %v2236_v35 = vadd.f32 %v2235_v49, %v2113_v14  ;;  %v2122_v10 = vpop.f32.mrf.mxu0 }
 0x5bc   : > { %v2521_v22 = vmin.f32 %v2458_v55, 0.0  ;;  %vm2505_vm8 = vcmp.gt.f32.partialorder %v2458_v55, 0.0 }
 0x5be   : > { %v2938_v3 = vpop.eup %2937  ;;  %v2542_v7 = vmul.f32 1.442695, %v2521_v22 }
 0x5bf   : > { %v2749_v44 = vadd.f32 -1.0, %v2938_v3  ;;  %v2364_v28 = vpop.f32.mrf.mxu2  ;;  %v2465_v38 = vpop.f32.mrf.mxu3 }
 0x5c0   : > { %2939 = vpow2.f32 %v2542_v7  ;;  %v2365_v8 = vadd.f32 %v2364_v28, %v2218_v47  ;;  %v2123_v47 = vadd.f32 %v2122_v10, %v4129_v30 }
 0x5c1   : > { %v2584_v37 = vsel %vm2504_vm7, %v2454_v62, %v2749_v44  ;;  %v2241_v23 = vpop.f32.mrf.mxu1 }
 0x5c2   : > { %2601 = vst.msk [vmem:[%s4172_s20 + $0x20] sm:$0xff] %vm2596_vm2, %v2584_v37  ;;  %v2462_v63 = vadd.f32 %v2461_v12, %v2365_v8  ;;  %v2242_v29 = vadd.f32 %v2241_v23, %v2118_v40  ;;  %v2127_v28 = vpop.f32.mrf.mxu0 }
 0x5c4   : > { %v2522_v21 = vmin.f32 %v2462_v63, 0.0  ;;  %vm2506_vm9 = vcmp.gt.f32.partialorder %v2462_v63, 0.0 }
 0x5c6   : > { %v2940_v53 = vpop.eup %2939  ;;  %v2544_v15 = vmul.f32 1.442695, %v2522_v21 }
 0x5c7   : > { %v2750_v4 = vadd.f32 -1.0, %v2940_v53  ;;  %v2368_v41 = vpop.f32.mrf.mxu2  ;;  %v2469_v1 = vpop.f32.mrf.mxu3  ;;  %v2128_v53 = vadd.f32 %v2127_v28, %v4133_v48 }
 0x5c8   : > { %2941 = vpow2.f32 %v2544_v15  ;;  %v2369_v26 = vadd.f32 %v2368_v41, %v2224_v20 }
 0x5c9   : > { %v2585_v2 = vsel %vm2505_vm8, %v2458_v55, %v2750_v4  ;;  %v2247_v55 = vpop.f32.mrf.mxu1 }
 0x5ca   : > { %2602 = vst.msk [vmem:[%s4172_s20 + $0x28] sm:$0xff] %vm2596_vm2, %v2585_v2  ;;  %v2466_v27 = vadd.f32 %v2465_v38, %v2369_v26  ;;  %v2248_v45 = vadd.f32 %v2247_v55, %v2123_v47  ;;  %v2132_v26 = vpop.f32.mrf.mxu0 }
 0x5cc   : > { %v2523_v9 = vmin.f32 %v2466_v27, 0.0  ;;  %vm2507_vm10 = vcmp.gt.f32.partialorder %v2466_v27, 0.0 }
 0x5ce   : > { %v2942_v5 = vpop.eup %2941  ;;  %v2546_v17 = vmul.f32 1.442695, %v2523_v9  ;;  %v2133_v9 = vadd.f32 %v2132_v26, %v4137_v34 }
 0x5cf   : > { %v2751_v57 = vadd.f32 -1.0, %v2942_v5  ;;  %v2372_v58 = vpop.f32.mrf.mxu2  ;;  %v2473_v46 = vpop.f32.mrf.mxu3 }
 0x5d0   : > { %2943 = vpow2.f32 %v2546_v17  ;;  %v2373_v13 = vadd.f32 %v2372_v58, %v2230_v24 }
 0x5d1   : > { %v2586_v54 = vsel %vm2506_vm9, %v2462_v63, %v2751_v57  ;;  %v2253_v21 = vpop.f32.mrf.mxu1 }
 0x5d2   : > { %2603 = vst.msk [vmem:[%s4172_s20 + $0x30] sm:$0xff] %vm2596_vm2, %v2586_v54  ;;  %v2470_v59 = vadd.f32 %v2469_v1, %v2373_v13  ;;  %v2254_v1 = vadd.f32 %v2253_v21, %v2128_v53 }
 0x5d4   : > { %v2524_v11 = vmin.f32 %v2470_v59, 0.0  ;;  %vm2508_vm11 = vcmp.gt.f32.partialorder %v2470_v59, 0.0 }
 0x5d6   : > { %v2944_v32 = vpop.eup %2943  ;;  %v2548_v62 = vmul.f32 1.442695, %v2524_v11 }
 0x5d7   : > { %v2752_v25 = vadd.f32 -1.0, %v2944_v32  ;;  %v2376_v51 = vpop.f32.mrf.mxu2  ;;  %v2477_v52 = vpop.f32.mrf.mxu3 }
 0x5d8   : > { %2945 = vpow2.f32 %v2548_v62  ;;  %v2377_v36 = vadd.f32 %v2376_v51, %v2236_v35 }
 0x5d9   : > { %v2587_v50 = vsel %vm2507_vm10, %v2466_v27, %v2752_v25  ;;  %v2259_v49 = vpop.f32.mrf.mxu1 }
 0x5da   : > { %2604 = vst.msk [vmem:[%s4172_s20 + $0x38] sm:$0xff] %vm2596_vm2, %v2587_v50  ;;  %v2474_v16 = vadd.f32 %v2473_v46, %v2377_v36  ;;  %v2260_v58 = vadd.f32 %v2259_v49, %v2133_v9  ;;  %v2137_v46 = vpop.f32.mrf.mxu0 }
 0x5dc   : > { %v2525_v12 = vmin.f32 %v2474_v16, 0.0  ;;  %vm2509_vm12 = vcmp.gt.f32.partialorder %v2474_v16, 0.0 }
 0x5de   : > { %v2946_v39 = vpop.eup %2945  ;;  %v2550_v19 = vmul.f32 1.442695, %v2525_v12 }
 0x5df   : > { %v2753_v42 = vadd.f32 -1.0, %v2946_v39  ;;  %v2380_v22 = vpop.f32.mrf.mxu2  ;;  %v2481_v7 = vpop.f32.mrf.mxu3 }
 0x5e0   : > { %2947 = vpow2.f32 %v2550_v19  ;;  %v2381_v3 = vadd.f32 %v2380_v22, %v2242_v29 }
 0x5e1   : > { %v2588_v61 = vsel %vm2508_vm11, %v2470_v59, %v2753_v42  ;;  %v2138_v59 = vadd.f32 %v2137_v46, %v4153_v43  ;;  %v2265_v11 = vpop.f32.mrf.mxu1 }
 0x5e2   : > { %2605 = vst.msk [vmem:[%s4172_s20 + $0x40] sm:$0xff] %vm2596_vm2, %v2588_v61  ;;  %v2478_v18 = vadd.f32 %v2477_v52, %v2381_v3  ;;  %v2142_v50 = vpop.f32.mrf.mxu0 }
 0x5e3   : > { %v2266_v35 = vadd.f32 %v2265_v11, %v2138_v59  ;;  %v2143_v43 = vadd.f32 %v2142_v50, %v4158_v0 }
 0x5e4   : > { %v2526_v44 = vmin.f32 %v2478_v18, 0.0  ;;  %vm2510_vm13 = vcmp.gt.f32.partialorder %v2478_v18, 0.0 }
 0x5e6   : > { %v2948_v38 = vpop.eup %2947  ;;  %v2552_v8 = vmul.f32 1.442695, %v2526_v44 }
 0x5e7   : > { %v2754_v37 = vadd.f32 -1.0, %v2948_v38  ;;  %v2384_v60 = vpop.f32.mrf.mxu2  ;;  %v2485_v15 = vpop.f32.mrf.mxu3 }
 0x5e8   : > { %2949 = vpow2.f32 %v2552_v8  ;;  %v2385_v63 = vadd.f32 %v2384_v60, %v2248_v45 }
 0x5e9   : > { %v2589_v6 = vsel %vm2509_vm12, %v2474_v16, %v2754_v37  ;;  %v2271_v12 = vpop.f32.mrf.mxu1 }
 0x5ea   : > { %2606 = vst.msk [vmem:[%s4172_s20 + $0x48] sm:$0xff] %vm2596_vm2, %v2589_v6  ;;  %v2482_v30 = vadd.f32 %v2481_v7, %v2385_v63  ;;  %v2272_v29 = vadd.f32 %v2271_v12, %v2143_v43 }
 0x5ec   : > { %v2527_v20 = vmin.f32 %v2482_v30, 0.0  ;;  %vm2511_vm14 = vcmp.gt.f32.partialorder %v2482_v30, 0.0 }
 0x5ee   : > { %v2950_v4 = vpop.eup %2949  ;;  %v2554_v41 = vmul.f32 1.442695, %v2527_v20 }
 0x5ef   : > { %v2755_v33 = vadd.f32 -1.0, %v2950_v4  ;;  %v2388_v2 = vpop.f32.mrf.mxu2  ;;  %v2489_v17 = vpop.f32.mrf.mxu3 }
 0x5f0   : > { %2951 = vpow2.f32 %v2554_v41  ;;  %v2389_v56 = vadd.f32 %v2388_v2, %v2254_v1 }
 0x5f1   : > { %v2590_v27 = vsel %vm2510_vm13, %v2478_v18, %v2755_v33 }
 0x5f2   : > { %2607 = vst.msk [vmem:[%s4172_s20 + $0x50] sm:$0xff] %vm2596_vm2, %v2590_v27  ;;  %v2486_v48 = vadd.f32 %v2485_v15, %v2389_v56 }
 0x5f4   : > { %v2528_v5 = vmin.f32 %v2486_v48, 0.0  ;;  %vm2512_vm15 = vcmp.gt.f32.partialorder %v2486_v48, 0.0 }
 0x5f6   : > { %v2952_v24 = vpop.eup %2951  ;;  %v2556_v57 = vmul.f32 1.442695, %v2528_v5 }
 0x5f7   : > { %v2756_v13 = vadd.f32 -1.0, %v2952_v24  ;;  %v2392_v31 = vpop.f32.mrf.mxu2  ;;  %v2493_v51 = vpop.f32.mrf.mxu3 }
 0x5f8   : > { %2953 = vpow2.f32 %v2556_v57  ;;  %v2393_v54 = vadd.f32 %v2392_v31, %v2260_v58 }
 0x5f9   : > { %v2591_v14 = vsel %vm2511_vm14, %v2482_v30, %v2756_v13 }
 0x5fa   : > { %2608 = vst.msk [vmem:[%s4172_s20 + $0x58] sm:$0xff] %vm2596_vm2, %v2591_v14  ;;  %v2490_v34 = vadd.f32 %v2489_v17, %v2393_v54 }
 0x5fc   : > { %v2529_v23 = vmin.f32 %v2490_v34, 0.0  ;;  %vm2513_vm0 = vcmp.gt.f32.partialorder %v2490_v34, 0.0 }
 0x5fe   : > { %v2954_v32 = vpop.eup %2953  ;;  %v2558_v62 = vmul.f32 1.442695, %v2529_v23 }
 0x5ff   : > { %v2757_v25 = vadd.f32 -1.0, %v2954_v32  ;;  %v2396_v52 = vpop.f32.mrf.mxu2  ;;  %v2497_v61 = vpop.f32.mrf.mxu3 }
 0x600   : > { %2955 = vpow2.f32 %v2558_v62  ;;  %v2397_v36 = vadd.f32 %v2396_v52, %v2266_v35 }
 0x601   : > { %v2592_v40 = vsel %vm2512_vm15, %v2486_v48, %v2757_v25 }
 0x602   : > { %2609 = vst.msk [vmem:[%s4172_s20 + $0x60] sm:$0xff] %vm2596_vm2, %v2592_v40  ;;  %v2494_v16 = vadd.f32 %v2493_v51, %v2397_v36 }
 0x604   : > { %v2530_v10 = vmin.f32 %v2494_v16, 0.0  ;;  %vm2514_vm1 = vcmp.gt.f32.partialorder %v2494_v16, 0.0 }
 0x606   : > { %v2956_v39 = vpop.eup %2955  ;;  %v2560_v19 = vmul.f32 1.442695, %v2530_v10 }
 0x607   : > { %v2758_v55 = vadd.f32 -1.0, %v2956_v39  ;;  %v2400_v42 = vpop.f32.mrf.mxu2 }
 0x608   : > { %2957 = vpow2.f32 %v2560_v19  ;;  %v2401_v22 = vadd.f32 %v2400_v42, %v2272_v29 }
 0x609   : > { %v2593_v3 = vsel %vm2513_vm0, %v2490_v34, %v2758_v55 }
 0x60a   : > { %2610 = vst.msk [vmem:[%s4172_s20 + $0x68] sm:$0xff] %vm2596_vm2, %v2593_v3  ;;  %v2498_v0 = vadd.f32 %v2497_v61, %v2401_v22 }
 0x60c   : > { %v2531_v7 = vmin.f32 %v2498_v0, 0.0  ;;  %vm2515_vm3 = vcmp.gt.f32.partialorder %v2498_v0, 0.0 }
 0x60e   : > { %v2958_v47 = vpop.eup %2957  ;;  %v2562_v18 = vmul.f32 1.442695, %v2531_v7 }
 0x60f   : > { %v2759_v44 = vadd.f32 -1.0, %v2958_v47 }
 0x610   : > { %2959 = vpow2.f32 %v2562_v18 }
 0x611   : > { %v2594_v28 = vsel %vm2514_vm1, %v2494_v16, %v2759_v44 }
 0x612   : > { %2611 = vst.msk [vmem:[%s4172_s20 + $0x70] sm:$0xff] %vm2596_vm2, %v2594_v28 }
 0x616   : > { %v2960_v38 = vpop.eup %2959 }
 0x617   : > { %v2760_v8 = vadd.f32 -1.0, %v2960_v38 }
 0x619   : > { %v2595_v45 = vsel %vm2515_vm3, %v2498_v0, %v2760_v8 }
 0x61a   : > { %2612 = vst.msk [vmem:[%s4172_s20 + $0x78] sm:$0xff] %vm2596_vm2, %v2595_v45 }
 0x61b PF: > { %s17_s19 = sadd.s32 1, %s3121_s19   ;;  %s4266_s22 = sld [smem:[#allocation9_spill]] }
 0x61c   : > { %p14_p4 = scmp.ge.s32.totalorder %s17_s19, 10   ;;  %s4267_s12 = smov %s3097_s13 }
 0x61d   : > { %s4268_s13 = smov %s3101_s14  ;;  %s4269_s14 = smov %s3242_s4 }
 0x61e   : > { %s4270_s15 = smov %s3113_s17  ;;  %s4271_s16 = smov %s3117_s18 }
 0x61f   : > { %s4272_s17 = smov %s4275_s8  ;;  %16 = sbr.rel (!%p14_p4) target bundleno = 9 (0x9), region = 80 }
 0x621   : > { %s4273_s18 = smov %s4266_s22 }
 0x624   :  { %2643 = vsyncpa [#allocation3], 1 }
 0x625   :  { %2645 = vsyncpa [#allocation3 + $0x1], 1 }
 0x626   :  { %2646 = vsyncpa [#allocation5], 1 }

</bundles_post_ra>
